<compile_context>
chip_gen: v7x
topology: tpu7x:2x2x1
jax: 0.10.0
libtpu: 0.0.40
codegen_flags: <defaults>
</compile_context>

<pallas_src>
import functools
import math

import numpy as np
import jax
import jax.numpy as jnp
from jax.experimental import pallas as pl
from jax.experimental.pallas import tpu as pltpu

LN_EPS = 1e-5
PADDING_VALUE = 0
MASK_NEG = -1e30          # finite: exp(MASK_NEG - m) == 0, no inf-inf -> NaN
LANE = 128
SUBLANE = 8


def _round_up(x, m):
    return ((x + m - 1) // m) * m


def _pad_axis(a, axis, new_size):
    pad = [(0, 0)] * a.ndim
    pad[axis] = (0, new_size - a.shape[axis])
    return jnp.pad(a, pad)


def _vmem_capacity_bytes():
    try:
        return int(pltpu.get_tpu_info().vmem_capacity_bytes)
    except Exception:
        return 64 << 20                      # v7x-safe fallback


def _gelu_exact(x):
    # torch.nn.GELU() default = exact (erf) gelu
    return 0.5 * x * (1.0 + jax.lax.erf(x * 0.7071067811865476))


def _layer_norm_padded(x, g, b, inv_e):
    # Moments over the lane-padded feature dim: pad columns are exactly zero,
    # so sum(x)/E_real and sum(x*x)/E_real are the true (unpadded) moments.
    mu = jnp.sum(x, axis=-1, keepdims=True) * inv_e
    msq = jnp.sum(x * x, axis=-1, keepdims=True) * inv_e
    var = jnp.maximum(msq - mu * mu, 0.0)
    return (x - mu) * jax.lax.rsqrt(var + LN_EPS) * g + b


# ------------------ fused transformer encoder (all layers) -----------------

def encoder_kernel(x_ref, maskb_ref,
                   wqkv_ref, bqkv_ref, wo_ref, bo_ref,
                   g1_ref, b1_ref, g2_ref, b2_ref,
                   w1_ref, fb1_ref, w2_ref, fb2_ref,
                   o_ref, *, num_heads, e_real, matmul_dtype):
    layer = pl.program_id(1)

    # Residual stream lives in the (layer-resident) output block.
    @pl.when(layer == 0)
    def _():
        o_ref[...] = x_ref[...]

    tb, L, E = o_ref.shape                 # E == E_pad (multiple of 128)
    hd = E // num_heads
    scale = 1.0 / math.sqrt(e_real // num_heads)
    inv_e = 1.0 / float(e_real)

    x = o_ref[...].reshape(tb * L, E)      # (TB*L, E) f32 residual stream
    mask_bias = maskb_ref[...]             # (TB, 1, L) f32 (0 / -1e30)

    # --- self-attention block (norm_first), fused QKV ---
    xn = _layer_norm_padded(x, g1_ref[...], b1_ref[...], inv_e)
    qkv = jnp.dot(xn.astype(matmul_dtype), wqkv_ref[...],
                  preferred_element_type=jnp.float32) + bqkv_ref[...]
    q = qkv[:, 0 * E:1 * E].astype(matmul_dtype)
    k = qkv[:, 1 * E:2 * E].astype(matmul_dtype)
    v = qkv[:, 2 * E:3 * E].astype(matmul_dtype)

    if num_heads == 1:
        qh = q.reshape(tb, L, hd)
        kh = k.reshape(tb, L, hd)
        vh = v.reshape(tb, L, hd)
        bias = mask_bias                                       # (TB, 1, L)
    else:
        # NOTE: einsum('bqhd,bkhd->bhqk') would re-insert the same transposes
        # at trace time, so keep them explicit (XLU relayout, H > 1 only).
        def split(t):
            return jnp.transpose(t.reshape(tb, L, num_heads, hd),
                                 (0, 2, 1, 3)).reshape(tb * num_heads, L, hd)
        qh, kh, vh = split(q), split(k), split(v)
        bias = jnp.broadcast_to(mask_bias[:, None], (tb, num_heads, 1, L))
        bias = bias.reshape(tb * num_heads, 1, L)

    s = jnp.einsum('bqd,bkd->bqk', qh, kh,
                   preferred_element_type=jnp.float32) * scale + bias
    s = s - jnp.max(s, axis=-1, keepdims=True)
    p = jnp.exp(s)
    p = p * pl.reciprocal(jnp.sum(p, axis=-1, keepdims=True), approx=True)
    ctx = jnp.einsum('bqk,bkd->bqd', p.astype(matmul_dtype), vh,
                     preferred_element_type=jnp.float32)

    if num_heads == 1:
        ctx = ctx.reshape(tb * L, E)
    else:
        ctx = jnp.transpose(ctx.reshape(tb, num_heads, L, hd),
                            (0, 2, 1, 3)).reshape(tb * L, E)

    attn = jnp.dot(ctx.astype(matmul_dtype), wo_ref[...],
                   preferred_element_type=jnp.float32) + bo_ref[...]
    x = x + attn

    # --- feed-forward block (norm_first) ---
    xn2 = _layer_norm_padded(x, g2_ref[...], b2_ref[...], inv_e)
    h1 = jnp.dot(xn2.astype(matmul_dtype), w1_ref[...],
                 preferred_element_type=jnp.float32) + fb1_ref[...]
    h1 = _gelu_exact(h1)
    h2 = jnp.dot(h1.astype(matmul_dtype), w2_ref[...],
                 preferred_element_type=jnp.float32) + fb2_ref[...]
    o_ref[...] = (x + h2).reshape(tb, L, E)


def encoder_pallas(x, mask_bias, stacked, *, num_heads, e_real, tb,
                   matmul_dtype, vmem_limit, cost):
    B, L, E = x.shape
    nl = stacked["wqkv"].shape[0]

    kern = functools.partial(encoder_kernel, num_heads=num_heads,
                             e_real=e_real, matmul_dtype=matmul_dtype)

    def wspec(arr):
        # stacked per-layer param (nl, ...): squeeze the layer dim, index by l
        tail = tuple(arr.shape[1:])
        nd = len(tail)
        return pl.BlockSpec((None,) + tail,
                            lambda b, l, _nd=nd: (l,) + (0,) * _nd)

    wnames = ("wqkv", "bqkv", "wo", "bo", "g1", "b1", "g2", "b2",
              "w1", "fb1", "w2", "fb2")
    weights = [stacked[n] for n in wnames]

    return pl.pallas_call(
        kern,
        grid=(B // tb, nl),
        in_specs=[pl.BlockSpec((tb, L, E), lambda b, l: (b, 0, 0)),   # x
                  pl.BlockSpec((tb, 1, L), lambda b, l: (b, 0, 0))]   # mask
                 + [wspec(w) for w in weights],
        out_specs=pl.BlockSpec((tb, L, E), lambda b, l: (b, 0, 0)),
        out_shape=jax.ShapeDtypeStruct((B, L, E), jnp.float32),
        compiler_params=pltpu.CompilerParams(
            dimension_semantics=("parallel", "arbitrary"),
            vmem_limit_bytes=vmem_limit),
        cost_estimate=cost,
    )(x, mask_bias, *weights)


# ------------------------------ score kernel -------------------------------

def score_kernel(enc_ref, poss_ref, o_ref):
    # enc: (TM, 1, E), poss: (TM, TN, E) -> (TM, 1, TN) on the MXU (f32 acc)
    o_ref[...] = jnp.einsum('bqd,bkd->bqk', enc_ref[...], poss_ref[...],
                            preferred_element_type=jnp.float32)


def score_pallas(enc, poss, matmul_dtype, vmem_cap):
    # enc: (M, 1, E) matmul_dtype, poss: (M, N, E) matmul_dtype
    M, _, E = enc.shape
    N = poss.shape[1]
    itemsize = np.dtype(matmul_dtype).itemsize

    tn = min(256, _round_up(N, LANE))                 # candidate tile (lanes)
    Npad = _round_up(N, tn)
    if Npad != N:
        poss = jnp.pad(poss, ((0, 0), (0, Npad - N), (0, 0)))

    budget = max(8 << 20, int(vmem_cap * 0.35))

    def est(t):
        return (2 * t * tn * E * itemsize             # poss block, dbl-buffered
                + 2 * t * E * itemsize                # enc block
                + 2 * t * SUBLANE * tn * 4            # out block (padded sublanes)
                + t * tn * 4)                         # f32 temp

    tm = min(256, _round_up(M, SUBLANE))
    while tm > SUBLANE and est(tm) > budget:
        tm //= 2
    tm = max(SUBLANE, _round_up(tm, SUBLANE))

    M_pad = _round_up(M, tm)
    if M_pad != M:
        enc = jnp.pad(enc, ((0, M_pad - M), (0, 0), (0, 0)))
        poss = jnp.pad(poss, ((0, M_pad - M), (0, 0), (0, 0)))

    vmem_limit = int(min(vmem_cap * 0.7, max(32 << 20, 2 * est(tm))))
    cost = pl.CostEstimate(
        flops=2 * M_pad * Npad * E,
        transcendentals=0,
        bytes_accessed=(M_pad * Npad * E * itemsize
                        + M_pad * E * itemsize
                        + M_pad * Npad * 4))

    out = pl.pallas_call(
        score_kernel,
        grid=(M_pad // tm, Npad // tn),
        in_specs=[pl.BlockSpec((tm, 1, E), lambda i, j: (i, 0, 0)),
                  pl.BlockSpec((tm, tn, E), lambda i, j: (i, j, 0))],
        out_specs=pl.BlockSpec((tm, 1, tn), lambda i, j: (i, 0, j)),
        out_shape=jax.ShapeDtypeStruct((M_pad, 1, Npad), jnp.float32),
        compiler_params=pltpu.CompilerParams(
            dimension_semantics=("parallel", "parallel"),
            vmem_limit_bytes=vmem_limit),
        cost_estimate=cost,
    )(enc, poss)
    return out[:M, 0, :N]


# ------------------------- weight / tile preparation ------------------------

def _prepare_params(params, num_heads, matmul_dtype):
    """Zero-pad the feature dims to lane multiples and stack per-layer weights."""
    item_emb = params["item_emb"]                      # (V, E)
    pos_emb = params["pos_emb"]                        # (L, E)
    layers = params["layers"]
    E = item_emb.shape[1]
    H = num_heads
    hd = E // H
    F = layers[0]["w1"].shape[1]                       # 4*E

    E_pad = _round_up(E, (LANE * H) // math.gcd(LANE, H))
    hd_pad = E_pad // H
    F_pad = _round_up(F, LANE)

    def pad_head_cols(w, b):                           # per-head output cols
        w = w.reshape(E, H, hd)
        w = _pad_axis(_pad_axis(w, 2, hd_pad), 0, E_pad)
        b = _pad_axis(b.reshape(1, H, hd), 2, hd_pad)
        return w.reshape(E_pad, E_pad), b.reshape(1, E_pad)

    def pad_head_rows(w):                              # per-head input rows
        w = w.reshape(H, hd, E)
        w = _pad_axis(_pad_axis(w, 1, hd_pad), 2, E_pad)
        return w.reshape(E_pad, E_pad)

    per_layer = []
    for lp in layers:
        wq, wk, wv = (lp["wqkv"][:, i * E:(i + 1) * E] for i in range(3))
        bq, bk, bv = (lp["bqkv"][:, i * E:(i + 1) * E] for i in range(3))
        wq_p, bq_p = pad_head_cols(wq, bq)
        wk_p, bk_p = pad_head_cols(wk, bk)
        wv_p, bv_p = pad_head_cols(wv, bv)
        per_layer.append(dict(
            wqkv=jnp.concatenate([wq_p, wk_p, wv_p], axis=1).astype(matmul_dtype),
            bqkv=jnp.concatenate([bq_p, bk_p, bv_p], axis=1),
            wo=pad_head_rows(lp["wo"]).astype(matmul_dtype),
            bo=_pad_axis(lp["bo"], 1, E_pad),
            g1=_pad_axis(lp["g1"], 1, E_pad), b1=_pad_axis(lp["b1"], 1, E_pad),
            g2=_pad_axis(lp["g2"], 1, E_pad), b2=_pad_axis(lp["b2"], 1, E_pad),
            w1=_pad_axis(_pad_axis(lp["w1"], 0, E_pad), 1, F_pad).astype(matmul_dtype),
            fb1=_pad_axis(lp["fb1"], 1, F_pad),
            w2=_pad_axis(_pad_axis(lp["w2"], 0, F_pad), 1, E_pad).astype(matmul_dtype),
            fb2=_pad_axis(lp["fb2"], 1, E_pad),
        ))
    stacked = {k: jnp.stack([d[k] for d in per_layer], axis=0)
               for k in per_layer[0]}

    item_emb_pad = _pad_axis(item_emb, 1, E_pad)
    pos_emb_pad = _pad_axis(pos_emb, 1, E_pad)
    return item_emb_pad, pos_emb_pad, stacked, E_pad, F_pad


def _choose_batch_tile(B, L, E_pad, F_pad, num_heads, itemsize, vmem_cap):
    target_rows = 512 if vmem_cap >= (100 << 20) else 256
    budget = int(vmem_cap * 0.45)

    def est(t):
        rows = t * L
        acts = 4 * rows * E_pad * 4                     # x in + out, dbl-buffered
        temps = rows * 16 * E_pad * 4 + rows * 2 * F_pad * 4
        scores = 2 * t * num_heads * L * L * 4
        weights = 2 * (4 * E_pad * E_pad + 2 * E_pad * F_pad) * itemsize
        return acts + temps + scores + weights

    tb = max(1, target_rows // L)
    while tb > 1 and est(tb) > budget:
        tb //= 2
    if B >= 2:
        tb = min(tb, (B + 1) // 2)      # >= 2 grid steps so both v7x TCs work
    tb = max(1, min(tb, B))
    return tb, est(tb)


# ------------------------------ full forward -------------------------------

def bert4rec_forward(params, input_seqs, items_to_predict, num_heads,
                     padding_value=PADDING_VALUE, matmul_dtype=jnp.bfloat16):
    B, L = input_seqs.shape
    E = params["item_emb"].shape[1]
    nl = len(params["layers"])
    itemsize = np.dtype(matmul_dtype).itemsize
    vmem_cap = _vmem_capacity_bytes()

    item_emb_p, pos_emb_p, stacked, E_pad, F_pad = _prepare_params(
        params, num_heads, matmul_dtype)

    # key padding mask -> finite additive bias, shared by all heads/queries
    key_mask = (input_seqs == padding_value)
    mask_bias = jnp.where(key_mask, MASK_NEG, 0.0).astype(jnp.float32)[:, None, :]

    # embeddings (gathers kept in plain JAX glue); dropout(p=0) == identity
    x = (item_emb_p[input_seqs] + pos_emb_p[None, :, :]).astype(jnp.float32)

    tb, est_bytes = _choose_batch_tile(B, L, E_pad, F_pad, num_heads,
                                       itemsize, vmem_cap)
    B_pad = _round_up(B, tb)
    if B_pad != B:
        x = jnp.pad(x, ((0, B_pad - B), (0, 0), (0, 0)))
        mask_bias = jnp.pad(mask_bias, ((0, B_pad - B), (0, 0), (0, 0)))

    vmem_limit = int(min(vmem_cap * 0.7, max(32 << 20, 2 * est_bytes)))

    flops_per_row = 2 * E_pad * (4 * E_pad + 2 * F_pad) + 4 * L * E_pad
    cost = pl.CostEstimate(
        flops=nl * B_pad * L * flops_per_row,
        transcendentals=nl * B_pad * (num_heads * L * L + L * F_pad),
        bytes_accessed=(2 * B_pad * L * E_pad * 4
                        + (B_pad // tb) * nl
                        * (4 * E_pad * E_pad + 2 * E_pad * F_pad) * itemsize))

    enc = encoder_pallas(x, mask_bias, stacked, num_heads=num_heads, e_real=E,
                         tb=tb, matmul_dtype=matmul_dtype,
                         vmem_limit=vmem_limit, cost=cost)[:B]

    s_out = items_to_predict.shape[1]
    N = items_to_predict.shape[2]
    M = B * s_out

    enc_md = enc[:, -s_out:, :].reshape(M, 1, E_pad).astype(matmul_dtype)
    # single HBM materialization of candidate embeddings, directly in matmul dtype
    item_emb_md = item_emb_p.astype(matmul_dtype)
    poss = item_emb_md[items_to_predict].reshape(M, N, E_pad)
    # TODO(synk): when B*S_out*N*E >> num_items*E (or candidates overlap
    # heavily), replace the gather + batched matvec with a weight-resident
    # enc @ item_emb^T matmul followed by a column gather of the requested ids.

    scores = score_pallas(enc_md, poss, matmul_dtype, vmem_cap)
    return scores.reshape(B, s_out, N)


# ------------------------- pure-JAX reference check ------------------------

def _layer_norm_ref(x, g, b):
    mu = jnp.mean(x, axis=-1, keepdims=True)
    var = jnp.mean((x - mu) ** 2, axis=-1, keepdims=True)
    return (x - mu) * jax.lax.rsqrt(var + LN_EPS) * g + b


def ref_forward(params, input_seqs, items_to_predict, num_heads,
                padding_value=PADDING_VALUE):
    item_emb = params["item_emb"]
    pos_emb = params["pos_emb"]
    B, L = input_seqs.shape
    E = item_emb.shape[1]
    hd = E // num_heads

    key_mask = (input_seqs == padding_value)
    bias = jnp.where(key_mask, MASK_NEG, 0.0)[:, None, None, :]   # (B,1,1,L)

    x = (item_emb[input_seqs] + pos_emb[None]).astype(jnp.float32)
    for p in params["layers"]:
        xn = _layer_norm_ref(x, p["g1"][0], p["b1"][0])
        qkv = xn @ p["wqkv"] + p["bqkv"][0]
        q, k, v = qkv[..., :E], qkv[..., E:2 * E], qkv[..., 2 * E:]
        qh = q.reshape(B, L, num_heads, hd).transpose(0, 2, 1, 3)
        kh = k.reshape(B, L, num_heads, hd).transpose(0, 2, 1, 3)
        vh = v.reshape(B, L, num_heads, hd).transpose(0, 2, 1, 3)
        s = jnp.einsum("bhqd,bhkd->bhqk", qh, kh) / math.sqrt(hd) + bias
        a = jax.nn.softmax(s, axis=-1)
        o = jnp.einsum("bhqk,bhkd->bhqd", a, vh).transpose(0, 2, 1, 3).reshape(B, L, E)
        x = x + o @ p["wo"] + p["bo"][0]
        xn2 = _layer_norm_ref(x, p["g2"][0], p["b2"][0])
        h = _gelu_exact(xn2 @ p["w1"] + p["fb1"][0])
        x = x + h @ p["w2"] + p["fb2"][0]

    s_out = items_to_predict.shape[1]
    enc = x[:, -s_out:, :]
    poss = item_emb[items_to_predict]
    return jnp.sum(poss * enc[:, :, None, :], axis=-1)


# ------------------------------ param init ---------------------------------

def init_params(key, num_items, emb_size, lookback, num_blocks):
    k_item, k_pos, k_layers = jax.random.split(key, 3)
    item_emb = jax.random.normal(k_item, (num_items + 2, emb_size), jnp.float32) * 0.05
    item_emb = item_emb.at[PADDING_VALUE].set(0.0)   # padding_idx=0 row is zero
    pos_emb = jax.random.normal(k_pos, (lookback, emb_size), jnp.float32) * 0.05

    layers = []
    for i in range(num_blocks):
        lk = jax.random.split(jax.random.fold_in(k_layers, i), 6)
        E, H = emb_size, 4 * emb_size
        layers.append(dict(
            # stored pre-transposed: activation @ W, W shape (in, out); QKV fused
            wqkv=jax.random.normal(lk[0], (E, 3 * E), jnp.float32) * 0.05,
            bqkv=jnp.zeros((1, 3 * E), jnp.float32),
            wo=jax.random.normal(lk[1], (E, E), jnp.float32) * 0.05,
            bo=jnp.zeros((1, E), jnp.float32),
            g1=jnp.ones((1, E), jnp.float32), b1=jnp.zeros((1, E), jnp.float32),
            g2=jnp.ones((1, E), jnp.float32), b2=jnp.zeros((1, E), jnp.float32),
            w1=jax.random.normal(lk[2], (E, H), jnp.float32) * 0.05,
            fb1=jnp.zeros((1, H), jnp.float32),
            w2=jax.random.normal(lk[3], (H, E), jnp.float32) * 0.05,
            fb2=jnp.zeros((1, E), jnp.float32),
        ))
    return dict(item_emb=item_emb, pos_emb=pos_emb, layers=layers)


# ---------------------------------- main ------------------------------------

if __name__ == "__main__":
    num_items = 50
    emb_size = 32
    lookback = 8          # L
    bert_num_blocks = 2   # exercises the fused (batch, layer) grid
    bert_num_heads = 1
    B, S_out, N = 2, 4, 6

    root = jax.random.PRNGKey(0)
    k_param, k_seq, k_items = jax.random.split(root, 3)

    params = init_params(k_param, num_items, emb_size, lookback, bert_num_blocks)

    # item ids in [1, num_items+1]; sprinkle a couple of padding zeros
    input_seqs = jax.random.randint(k_seq, (B, lookback), 1, num_items + 2, jnp.int32)
    input_seqs = input_seqs.at[0, 0].set(PADDING_VALUE).at[1, 1].set(PADDING_VALUE)
    items_to_predict = jax.random.randint(k_items, (B, S_out, N), 1, num_items + 2, jnp.int32)

    ref = ref_forward(params, input_seqs, items_to_predict, bert_num_heads)

    # f32-operand path: tight check against the pure-JAX reference.
    scores_f32 = bert4rec_forward(params, input_seqs, items_to_predict,
                                  bert_num_heads, matmul_dtype=jnp.float32)
    scores_f32 = jax.block_until_ready(scores_f32)
    assert scores_f32.shape == (B, S_out, N)
    assert jnp.allclose(scores_f32, ref, atol=5e-3, rtol=5e-3), "f32 kernel mismatch"

    # bf16-operand path (default, fast on v6e/v7x): looser tolerance.
    scores = bert4rec_forward(params, input_seqs, items_to_predict,
                              bert_num_heads, matmul_dtype=jnp.bfloat16)
    scores = jax.block_until_ready(scores)
    assert scores.shape == (B, S_out, N)
    assert jnp.allclose(scores, ref, atol=5e-2, rtol=5e-2), "bf16 kernel mismatch"

    print("KERNEL_OK")
</pallas_src>

<mosaic_0001>
module attributes {stable_mosaic.version = 11 : i64} {
  func.func @encoder_kernel(%arg0: i32, %arg1: i32, %arg2: memref<1x8x128xf32, #tpu.memory_space<vmem>>, %arg3: memref<1x1x8xf32, #tpu.memory_space<vmem>>, %arg4: memref<1x128x384xf32, #tpu.memory_space<vmem>>, %arg5: memref<1x1x384xf32, #tpu.memory_space<vmem>>, %arg6: memref<1x128x128xf32, #tpu.memory_space<vmem>>, %arg7: memref<1x1x128xf32, #tpu.memory_space<vmem>>, %arg8: memref<1x1x128xf32, #tpu.memory_space<vmem>>, %arg9: memref<1x1x128xf32, #tpu.memory_space<vmem>>, %arg10: memref<1x1x128xf32, #tpu.memory_space<vmem>>, %arg11: memref<1x1x128xf32, #tpu.memory_space<vmem>>, %arg12: memref<1x128x128xf32, #tpu.memory_space<vmem>>, %arg13: memref<1x1x128xf32, #tpu.memory_space<vmem>>, %arg14: memref<1x128x128xf32, #tpu.memory_space<vmem>>, %arg15: memref<1x1x128xf32, #tpu.memory_space<vmem>>, %arg16: memref<1x8x128xf32, #tpu.memory_space<vmem>>) attributes {dimension_semantics = [#tpu.dimension_semantics<parallel>, #tpu.dimension_semantics<arbitrary>], iteration_bounds = array<i64: 2, 2>, scalar_prefetch = 0 : i64, scratch_operands = 0 : i64, tpu.core_type = #tpu.core_type<tc>, window_params = [{transform_indices = @transform_0, window_bounds = array<i64: 1, 8, 128>}, {transform_indices = @transform_1, window_bounds = array<i64: 1, 1, 8>}, {transform_indices = @transform_2, window_bounds = array<i64: 1, 128, 384>}, {transform_indices = @transform_3, window_bounds = array<i64: 1, 1, 384>}, {transform_indices = @transform_4, window_bounds = array<i64: 1, 128, 128>}, {transform_indices = @transform_5, window_bounds = array<i64: 1, 1, 128>}, {transform_indices = @transform_6, window_bounds = array<i64: 1, 1, 128>}, {transform_indices = @transform_7, window_bounds = array<i64: 1, 1, 128>}, {transform_indices = @transform_8, window_bounds = array<i64: 1, 1, 128>}, {transform_indices = @transform_9, window_bounds = array<i64: 1, 1, 128>}, {transform_indices = @transform_10, window_bounds = array<i64: 1, 128, 128>}, {transform_indices = @transform_11, window_bounds = array<i64: 1, 1, 128>}, {transform_indices = @transform_12, window_bounds = array<i64: 1, 128, 128>}, {transform_indices = @transform_13, window_bounds = array<i64: 1, 1, 128>}, {transform_indices = @transform_14, window_bounds = array<i64: 1, 8, 128>}]} {
    %c0_i32 = arith.constant 0 : i32
    %0 = arith.cmpi eq, %arg1, %c0_i32 : i32
    %1 = arith.extui %0 : i1 to i32
    %c0_i32_0 = arith.constant 0 : i32
    %2 = arith.cmpi ne, %1, %c0_i32_0 : i32
    scf.if %2 {
      %c0_68 = arith.constant 0 : index
      %c0_69 = arith.constant 0 : index
      %c0_70 = arith.constant 0 : index
      %125 = vector.load %arg2[%c0_68, %c0_69, %c0_70] : memref<1x8x128xf32, #tpu.memory_space<vmem>>, vector<1x8x128xf32>
      %c0_71 = arith.constant 0 : index
      %c0_72 = arith.constant 0 : index
      %c0_73 = arith.constant 0 : index
      %126 = vector.load %arg16[%c0_71, %c0_72, %c0_73] : memref<1x8x128xf32, #tpu.memory_space<vmem>>, vector<1x8x128xf32>
      tpu.vector_store %arg16[%c0_71, %c0_72, %c0_73], %125 {strides = array<i32>} : memref<1x8x128xf32, #tpu.memory_space<vmem>>, vector<1x8x128xf32>,
    } else {
    }
    %c0 = arith.constant 0 : index
    %c0_1 = arith.constant 0 : index
    %c0_2 = arith.constant 0 : index
    %3 = vector.load %arg16[%c0, %c0_1, %c0_2] : memref<1x8x128xf32, #tpu.memory_space<vmem>>, vector<1x8x128xf32>
    %4 = vector.shape_cast %3 : vector<1x8x128xf32> to vector<8x128xf32>
    %c0_3 = arith.constant 0 : index
    %c0_4 = arith.constant 0 : index
    %c0_5 = arith.constant 0 : index
    %5 = vector.load %arg3[%c0_3, %c0_4, %c0_5] : memref<1x1x8xf32, #tpu.memory_space<vmem>>, vector<1x1x8xf32>
    %c0_6 = arith.constant 0 : index
    %c0_7 = arith.constant 0 : index
    %c0_8 = arith.constant 0 : index
    %6 = vector.load %arg8[%c0_6, %c0_7, %c0_8] : memref<1x1x128xf32, #tpu.memory_space<vmem>>, vector<1x1x128xf32>
    %7 = vector.shape_cast %6 : vector<1x1x128xf32> to vector<1x128xf32>
    %c0_9 = arith.constant 0 : index
    %c0_10 = arith.constant 0 : index
    %c0_11 = arith.constant 0 : index
    %8 = vector.load %arg9[%c0_9, %c0_10, %c0_11] : memref<1x1x128xf32, #tpu.memory_space<vmem>>, vector<1x1x128xf32>
    %9 = vector.shape_cast %8 : vector<1x1x128xf32> to vector<1x128xf32>
    %cst = arith.constant dense<0.000000e+00> : vector<8xf32>
    %10 = vector.multi_reduction <add>, %4, %cst [1] : vector<8x128xf32> to vector<8xf32>
    %11 = vector.shape_cast %10 : vector<8xf32> to vector<8x1xf32>
    %cst_12 = arith.constant 3.125000e-02 : f32
    %12 = vector.broadcast %cst_12 : f32 to vector<8x1xf32>
    %13 = arith.mulf %11, %12 : vector<8x1xf32>
    %14 = arith.mulf %4, %4 : vector<8x128xf32>
    %cst_13 = arith.constant dense<0.000000e+00> : vector<8xf32>
    %15 = vector.multi_reduction <add>, %14, %cst_13 [1] : vector<8x128xf32> to vector<8xf32>
    %16 = vector.shape_cast %15 : vector<8xf32> to vector<8x1xf32>
    %cst_14 = arith.constant 3.125000e-02 : f32
    %17 = vector.broadcast %cst_14 : f32 to vector<8x1xf32>
    %18 = arith.mulf %16, %17 : vector<8x1xf32>
    %19 = arith.mulf %13, %13 : vector<8x1xf32>
    %20 = arith.subf %18, %19 : vector<8x1xf32>
    %cst_15 = arith.constant 0.000000e+00 : f32
    %21 = vector.broadcast %cst_15 : f32 to vector<8x1xf32>
    %22 = arith.maximumf %20, %21 : vector<8x1xf32>
    %23 = vector.broadcast %13 : vector<8x1xf32> to vector<8x128xf32>
    %24 = arith.subf %4, %23 : vector<8x128xf32>
    %cst_16 = arith.constant 9.99999974E-6 : f32
    %25 = vector.broadcast %cst_16 : f32 to vector<8x1xf32>
    %26 = arith.addf %22, %25 : vector<8x1xf32>
    %27 = math.rsqrt %26 : vector<8x1xf32>
    %28 = vector.broadcast %27 : vector<8x1xf32> to vector<8x128xf32>
    %29 = arith.mulf %24, %28 : vector<8x128xf32>
    %30 = vector.broadcast %7 : vector<1x128xf32> to vector<8x128xf32>
    %31 = arith.mulf %29, %30 : vector<8x128xf32>
    %32 = vector.broadcast %9 : vector<1x128xf32> to vector<8x128xf32>
    %33 = arith.addf %31, %32 : vector<8x128xf32>
    %c0_17 = arith.constant 0 : index
    %c0_18 = arith.constant 0 : index
    %c0_19 = arith.constant 0 : index
    %34 = vector.load %arg4[%c0_17, %c0_18, %c0_19] : memref<1x128x384xf32, #tpu.memory_space<vmem>>, vector<1x128x384xf32>
    %35 = vector.shape_cast %34 : vector<1x128x384xf32> to vector<128x384xf32>
    %cst_20 = arith.constant dense<0.000000e+00> : vector<8x384xf32>
    %36 = tpu.matmul %33, %35, %cst_20 {dimension_numbers = #tpu.dot_dimension_numbers<[1], [0], [0], [1], [0, 0, 1, 1], [], []>} : vector<8x128xf32>, vector<128x384xf32>, vector<8x384xf32> -> vector<8x384xf32>
    %c0_21 = arith.constant 0 : index
    %c0_22 = arith.constant 0 : index
    %c0_23 = arith.constant 0 : index
    %37 = vector.load %arg5[%c0_21, %c0_22, %c0_23] : memref<1x1x384xf32, #tpu.memory_space<vmem>>, vector<1x1x384xf32>
    %38 = vector.shape_cast %37 : vector<1x1x384xf32> to vector<1x384xf32>
    %39 = vector.broadcast %38 : vector<1x384xf32> to vector<8x384xf32>
    %40 = arith.addf %36, %39 : vector<8x384xf32>
    %41 = vector.extract_strided_slice %40 {offsets = [0, 0], sizes = [8, 128], strides = [1, 1]} : vector<8x384xf32> to vector<8x128xf32>
    %42 = vector.extract_strided_slice %40 {offsets = [0, 128], sizes = [8, 128], strides = [1, 1]} : vector<8x384xf32> to vector<8x128xf32>
    %43 = vector.extract_strided_slice %40 {offsets = [0, 256], sizes = [8, 128], strides = [1, 1]} : vector<8x384xf32> to vector<8x128xf32>
    %44 = vector.shape_cast %41 : vector<8x128xf32> to vector<1x8x128xf32>
    %45 = vector.shape_cast %42 : vector<8x128xf32> to vector<1x8x128xf32>
    %46 = vector.shape_cast %43 : vector<8x128xf32> to vector<1x8x128xf32>
    "tpu.trace_start"() <{level = 10 : i32, message = "bqd,bkd->bqk"}> : () -> ()
    %cst_24 = arith.constant dense<0.000000e+00> : vector<1x8x8xf32>
    %47 = tpu.matmul %44, %45, %cst_24 {dimension_numbers = #tpu.dot_dimension_numbers<[2], [2], [1], [1], [0, 0, 0, 1, 1, 1], [0], [0]>} : vector<1x8x128xf32>, vector<1x8x128xf32>, vector<1x8x8xf32> -> vector<1x8x8xf32>
    "tpu.trace_stop"() : () -> ()
    %cst_25 = arith.constant 0.176776692 : f32
    %48 = vector.broadcast %cst_25 : f32 to vector<1x8x8xf32>
    %49 = arith.mulf %47, %48 : vector<1x8x8xf32>
    %50 = vector.broadcast %5 : vector<1x1x8xf32> to vector<1x8x8xf32>
    %51 = arith.addf %49, %50 : vector<1x8x8xf32>
    %cst_26 = arith.constant dense<0xFF800000> : vector<1x8xf32>
    %52 = vector.multi_reduction <maximumf>, %51, %cst_26 [2] : vector<1x8x8xf32> to vector<1x8xf32>
    %53 = vector.shape_cast %52 : vector<1x8xf32> to vector<1x8x1xf32>
    %54 = vector.broadcast %53 : vector<1x8x1xf32> to vector<1x8x8xf32>
    %55 = arith.subf %51, %54 : vector<1x8x8xf32>
    %56 = math.exp %55 : vector<1x8x8xf32>
    %cst_27 = arith.constant dense<0.000000e+00> : vector<1x8xf32>
    %57 = vector.multi_reduction <add>, %56, %cst_27 [2] : vector<1x8x8xf32> to vector<1x8xf32>
    %58 = vector.shape_cast %57 : vector<1x8xf32> to vector<1x8x1xf32>
    %59 = tpu.reciprocal %58 {approx = true} : vector<1x8x1xf32> -> vector<1x8x1xf32>
    %60 = vector.broadcast %59 : vector<1x8x1xf32> to vector<1x8x8xf32>
    %61 = arith.mulf %56, %60 : vector<1x8x8xf32>
    "tpu.trace_start"() <{level = 10 : i32, message = "bqk,bkd->bqd"}> : () -> ()
    %cst_28 = arith.constant dense<0.000000e+00> : vector<1x8x128xf32>
    %62 = tpu.matmul %61, %46, %cst_28 {dimension_numbers = #tpu.dot_dimension_numbers<[2], [1], [1], [2], [0, 0, 0, 1, 1, 2], [0], [0]>} : vector<1x8x8xf32>, vector<1x8x128xf32>, vector<1x8x128xf32> -> vector<1x8x128xf32>
    "tpu.trace_stop"() : () -> ()
    %63 = vector.shape_cast %62 : vector<1x8x128xf32> to vector<8x128xf32>
    %c0_29 = arith.constant 0 : index
    %c0_30 = arith.constant 0 : index
    %c0_31 = arith.constant 0 : index
    %64 = vector.load %arg6[%c0_29, %c0_30, %c0_31] : memref<1x128x128xf32, #tpu.memory_space<vmem>>, vector<1x128x128xf32>
    %65 = vector.shape_cast %64 : vector<1x128x128xf32> to vector<128x128xf32>
    %cst_32 = arith.constant dense<0.000000e+00> : vector<8x128xf32>
    %66 = tpu.matmul %63, %65, %cst_32 {dimension_numbers = #tpu.dot_dimension_numbers<[1], [0], [0], [1], [0, 0, 1, 1], [], []>} : vector<8x128xf32>, vector<128x128xf32>, vector<8x128xf32> -> vector<8x128xf32>
    %c0_33 = arith.constant 0 : index
    %c0_34 = arith.constant 0 : index
    %c0_35 = arith.constant 0 : index
    %67 = vector.load %arg7[%c0_33, %c0_34, %c0_35] : memref<1x1x128xf32, #tpu.memory_space<vmem>>, vector<1x1x128xf32>
    %68 = vector.shape_cast %67 : vector<1x1x128xf32> to vector<1x128xf32>
    %69 = vector.broadcast %68 : vector<1x128xf32> to vector<8x128xf32>
    %70 = arith.addf %66, %69 : vector<8x128xf32>
    %71 = arith.addf %4, %70 : vector<8x128xf32>
    %c0_36 = arith.constant 0 : index
    %c0_37 = arith.constant 0 : index
    %c0_38 = arith.constant 0 : index
    %72 = vector.load %arg10[%c0_36, %c0_37, %c0_38] : memref<1x1x128xf32, #tpu.memory_space<vmem>>, vector<1x1x128xf32>
    %73 = vector.shape_cast %72 : vector<1x1x128xf32> to vector<1x128xf32>
    %c0_39 = arith.constant 0 : index
    %c0_40 = arith.constant 0 : index
    %c0_41 = arith.constant 0 : index
    %74 = vector.load %arg11[%c0_39, %c0_40, %c0_41] : memref<1x1x128xf32, #tpu.memory_space<vmem>>, vector<1x1x128xf32>
    %75 = vector.shape_cast %74 : vector<1x1x128xf32> to vector<1x128xf32>
    %cst_42 = arith.constant dense<0.000000e+00> : vector<8xf32>
    %76 = vector.multi_reduction <add>, %71, %cst_42 [1] : vector<8x128xf32> to vector<8xf32>
    %77 = vector.shape_cast %76 : vector<8xf32> to vector<8x1xf32>
    %cst_43 = arith.constant 3.125000e-02 : f32
    %78 = vector.broadcast %cst_43 : f32 to vector<8x1xf32>
    %79 = arith.mulf %77, %78 : vector<8x1xf32>
    %80 = arith.mulf %71, %71 : vector<8x128xf32>
    %cst_44 = arith.constant dense<0.000000e+00> : vector<8xf32>
    %81 = vector.multi_reduction <add>, %80, %cst_44 [1] : vector<8x128xf32> to vector<8xf32>
    %82 = vector.shape_cast %81 : vector<8xf32> to vector<8x1xf32>
    %cst_45 = arith.constant 3.125000e-02 : f32
    %83 = vector.broadcast %cst_45 : f32 to vector<8x1xf32>
    %84 = arith.mulf %82, %83 : vector<8x1xf32>
    %85 = arith.mulf %79, %79 : vector<8x1xf32>
    %86 = arith.subf %84, %85 : vector<8x1xf32>
    %cst_46 = arith.constant 0.000000e+00 : f32
    %87 = vector.broadcast %cst_46 : f32 to vector<8x1xf32>
    %88 = arith.maximumf %86, %87 : vector<8x1xf32>
    %89 = vector.broadcast %79 : vector<8x1xf32> to vector<8x128xf32>
    %90 = arith.subf %71, %89 : vector<8x128xf32>
    %cst_47 = arith.constant 9.99999974E-6 : f32
    %91 = vector.broadcast %cst_47 : f32 to vector<8x1xf32>
    %92 = arith.addf %88, %91 : vector<8x1xf32>
    %93 = math.rsqrt %92 : vector<8x1xf32>
    %94 = vector.broadcast %93 : vector<8x1xf32> to vector<8x128xf32>
    %95 = arith.mulf %90, %94 : vector<8x128xf32>
    %96 = vector.broadcast %73 : vector<1x128xf32> to vector<8x128xf32>
    %97 = arith.mulf %95, %96 : vector<8x128xf32>
    %98 = vector.broadcast %75 : vector<1x128xf32> to vector<8x128xf32>
    %99 = arith.addf %97, %98 : vector<8x128xf32>
    %c0_48 = arith.constant 0 : index
    %c0_49 = arith.constant 0 : index
    %c0_50 = arith.constant 0 : index
    %100 = vector.load %arg12[%c0_48, %c0_49, %c0_50] : memref<1x128x128xf32, #tpu.memory_space<vmem>>, vector<1x128x128xf32>
    %101 = vector.shape_cast %100 : vector<1x128x128xf32> to vector<128x128xf32>
    %cst_51 = arith.constant dense<0.000000e+00> : vector<8x128xf32>
    %102 = tpu.matmul %99, %101, %cst_51 {dimension_numbers = #tpu.dot_dimension_numbers<[1], [0], [0], [1], [0, 0, 1, 1], [], []>} : vector<8x128xf32>, vector<128x128xf32>, vector<8x128xf32> -> vector<8x128xf32>
    %c0_52 = arith.constant 0 : index
    %c0_53 = arith.constant 0 : index
    %c0_54 = arith.constant 0 : index
    %103 = vector.load %arg13[%c0_52, %c0_53, %c0_54] : memref<1x1x128xf32, #tpu.memory_space<vmem>>, vector<1x1x128xf32>
    %104 = vector.shape_cast %103 : vector<1x1x128xf32> to vector<1x128xf32>
    %105 = vector.broadcast %104 : vector<1x128xf32> to vector<8x128xf32>
    %106 = arith.addf %102, %105 : vector<8x128xf32>
    %cst_55 = arith.constant 5.000000e-01 : f32
    %107 = vector.broadcast %cst_55 : f32 to vector<8x128xf32>
    %108 = arith.mulf %107, %106 : vector<8x128xf32>
    %cst_56 = arith.constant 0.707106769 : f32
    %109 = vector.broadcast %cst_56 : f32 to vector<8x128xf32>
    %110 = arith.mulf %106, %109 : vector<8x128xf32>
    %111 = math.erf %110 : vector<8x128xf32>
    %cst_57 = arith.constant 1.000000e+00 : f32
    %112 = vector.broadcast %cst_57 : f32 to vector<8x128xf32>
    %113 = arith.addf %112, %111 : vector<8x128xf32>
    %114 = arith.mulf %108, %113 : vector<8x128xf32>
    %c0_58 = arith.constant 0 : index
    %c0_59 = arith.constant 0 : index
    %c0_60 = arith.constant 0 : index
    %115 = vector.load %arg14[%c0_58, %c0_59, %c0_60] : memref<1x128x128xf32, #tpu.memory_space<vmem>>, vector<1x128x128xf32>
    %116 = vector.shape_cast %115 : vector<1x128x128xf32> to vector<128x128xf32>
    %cst_61 = arith.constant dense<0.000000e+00> : vector<8x128xf32>
    %117 = tpu.matmul %114, %116, %cst_61 {dimension_numbers = #tpu.dot_dimension_numbers<[1], [0], [0], [1], [0, 0, 1, 1], [], []>} : vector<8x128xf32>, vector<128x128xf32>, vector<8x128xf32> -> vector<8x128xf32>
    %c0_62 = arith.constant 0 : index
    %c0_63 = arith.constant 0 : index
    %c0_64 = arith.constant 0 : index
    %118 = vector.load %arg15[%c0_62, %c0_63, %c0_64] : memref<1x1x128xf32, #tpu.memory_space<vmem>>, vector<1x1x128xf32>
    %119 = vector.shape_cast %118 : vector<1x1x128xf32> to vector<1x128xf32>
    %120 = vector.broadcast %119 : vector<1x128xf32> to vector<8x128xf32>
    %121 = arith.addf %117, %120 : vector<8x128xf32>
    %122 = arith.addf %71, %121 : vector<8x128xf32>
    %123 = vector.shape_cast %122 : vector<8x128xf32> to vector<1x8x128xf32>
    %c0_65 = arith.constant 0 : index
    %c0_66 = arith.constant 0 : index
    %c0_67 = arith.constant 0 : index
    %124 = vector.load %arg16[%c0_65, %c0_66, %c0_67] : memref<1x8x128xf32, #tpu.memory_space<vmem>>, vector<1x8x128xf32>
    tpu.vector_store %arg16[%c0_65, %c0_66, %c0_67], %123 {strides = array<i32>} : memref<1x8x128xf32, #tpu.memory_space<vmem>>, vector<1x8x128xf32>,
    return
  }
  func.func @transform_0(%arg0: i32, %arg1: i32) -> (i32, i32, i32) {
    %c0_i32 = arith.constant 0 : i32
    %c0_i32_0 = arith.constant 0 : i32
    %c0_i32_1 = arith.constant 0 : i32
    return %arg0, %c0_i32, %c0_i32_0 : i32, i32, i32
  }
  func.func @transform_1(%arg0: i32, %arg1: i32) -> (i32, i32, i32) {
    %c0_i32 = arith.constant 0 : i32
    %c0_i32_0 = arith.constant 0 : i32
    %c0_i32_1 = arith.constant 0 : i32
    return %arg0, %c0_i32, %c0_i32_0 : i32, i32, i32
  }
  func.func @transform_2(%arg0: i32, %arg1: i32) -> (i32, i32, i32) {
    %c0_i32 = arith.constant 0 : i32
    %c0_i32_0 = arith.constant 0 : i32
    %c0_i32_1 = arith.constant 0 : i32
    return %arg1, %c0_i32, %c0_i32_0 : i32, i32, i32
  }
  func.func @transform_3(%arg0: i32, %arg1: i32) -> (i32, i32, i32) {
    %c0_i32 = arith.constant 0 : i32
    %c0_i32_0 = arith.constant 0 : i32
    %c0_i32_1 = arith.constant 0 : i32
    return %arg1, %c0_i32, %c0_i32_0 : i32, i32, i32
  }
  func.func @transform_4(%arg0: i32, %arg1: i32) -> (i32, i32, i32) {
    %c0_i32 = arith.constant 0 : i32
    %c0_i32_0 = arith.constant 0 : i32
    %c0_i32_1 = arith.constant 0 : i32
    return %arg1, %c0_i32, %c0_i32_0 : i32, i32, i32
  }
  func.func @transform_5(%arg0: i32, %arg1: i32) -> (i32, i32, i32) {
    %c0_i32 = arith.constant 0 : i32
    %c0_i32_0 = arith.constant 0 : i32
    %c0_i32_1 = arith.constant 0 : i32
    return %arg1, %c0_i32, %c0_i32_0 : i32, i32, i32
  }
  func.func @transform_6(%arg0: i32, %arg1: i32) -> (i32, i32, i32) {
    %c0_i32 = arith.constant 0 : i32
    %c0_i32_0 = arith.constant 0 : i32
    %c0_i32_1 = arith.constant 0 : i32
    return %arg1, %c0_i32, %c0_i32_0 : i32, i32, i32
  }
  func.func @transform_7(%arg0: i32, %arg1: i32) -> (i32, i32, i32) {
    %c0_i32 = arith.constant 0 : i32
    %c0_i32_0 = arith.constant 0 : i32
    %c0_i32_1 = arith.constant 0 : i32
    return %arg1, %c0_i32, %c0_i32_0 : i32, i32, i32
  }
  func.func @transform_8(%arg0: i32, %arg1: i32) -> (i32, i32, i32) {
    %c0_i32 = arith.constant 0 : i32
    %c0_i32_0 = arith.constant 0 : i32
    %c0_i32_1 = arith.constant 0 : i32
    return %arg1, %c0_i32, %c0_i32_0 : i32, i32, i32
  }
  func.func @transform_9(%arg0: i32, %arg1: i32) -> (i32, i32, i32) {
    %c0_i32 = arith.constant 0 : i32
    %c0_i32_0 = arith.constant 0 : i32
    %c0_i32_1 = arith.constant 0 : i32
    return %arg1, %c0_i32, %c0_i32_0 : i32, i32, i32
  }
  func.func @transform_10(%arg0: i32, %arg1: i32) -> (i32, i32, i32) {
    %c0_i32 = arith.constant 0 : i32
    %c0_i32_0 = arith.constant 0 : i32
    %c0_i32_1 = arith.constant 0 : i32
    return %arg1, %c0_i32, %c0_i32_0 : i32, i32, i32
  }
  func.func @transform_11(%arg0: i32, %arg1: i32) -> (i32, i32, i32) {
    %c0_i32 = arith.constant 0 : i32
    %c0_i32_0 = arith.constant 0 : i32
    %c0_i32_1 = arith.constant 0 : i32
    return %arg1, %c0_i32, %c0_i32_0 : i32, i32, i32
  }
  func.func @transform_12(%arg0: i32, %arg1: i32) -> (i32, i32, i32) {
    %c0_i32 = arith.constant 0 : i32
    %c0_i32_0 = arith.constant 0 : i32
    %c0_i32_1 = arith.constant 0 : i32
    return %arg1, %c0_i32, %c0_i32_0 : i32, i32, i32
  }
  func.func @transform_13(%arg0: i32, %arg1: i32) -> (i32, i32, i32) {
    %c0_i32 = arith.constant 0 : i32
    %c0_i32_0 = arith.constant 0 : i32
    %c0_i32_1 = arith.constant 0 : i32
    return %arg1, %c0_i32, %c0_i32_0 : i32, i32, i32
  }
  func.func @transform_14(%arg0: i32, %arg1: i32) -> (i32, i32, i32) {
    %c0_i32 = arith.constant 0 : i32
    %c0_i32_0 = arith.constant 0 : i32
    %c0_i32_1 = arith.constant 0 : i32
    return %arg0, %c0_i32, %c0_i32_0 : i32, i32, i32
  }
}

</mosaic_0001>

<bundles_post_ra>
// kernel: tpu_custom_call.1
= control target key start
LH: loop header
LB: loop body
LE: loop exit
PB: predicated region body
PF: predicated region fallthrough
CT: control target
= control target key end

     0   :  { %s3374_s0 = inlined_call_operand.hbm [shape: f32[2,8,128], index: 0, kind: input, shape index: {}]   ;;  %s3375_s1 = inlined_call_operand.vmem [shape: f32[2,1,8], index: 1, kind: input, shape index: {}]   ;;  %s3376_s2 = inlined_call_operand.hbm [shape: f32[2,128,384], index: 2, kind: input, shape index: {}]   ;;  %s3377_s3 = inlined_call_operand.vmem [shape: f32[2,1,384], index: 3, kind: input, shape index: {}]   ;;  %s3378_s4 = inlined_call_operand.hbm [shape: f32[2,128,128], index: 4, kind: input, shape index: {}]   ;;  %s3379_s5 = inlined_call_operand.vmem [shape: f32[2,1,128], index: 5, kind: input, shape index: {}]   ;;  %s3380_s6 = inlined_call_operand.vmem [shape: f32[2,1,128], index: 6, kind: input, shape index: {}]   ;;  %s3381_s7 = inlined_call_operand.vmem [shape: f32[2,1,128], index: 7, kind: input, shape index: {}]   ;;  %s3382_s8 = inlined_call_operand.vmem [shape: f32[2,1,128], index: 8, kind: input, shape index: {}]   ;;  %s3383_s9 = inlined_call_operand.vmem [shape: f32[2,1,128], index: 9, kind: input, shape index: {}]   ;;  %s3384_s10 = inlined_call_operand.hbm [shape: f32[2,128,128], index: 10, kind: input, shape index: {}]   ;;  %s3385_s11 = inlined_call_operand.vmem [shape: f32[2,1,128], index: 11, kind: input, shape index: {}]   ;;  %s3386_s12 = inlined_call_operand.hbm [shape: f32[2,128,128], index: 12, kind: input, shape index: {}]   ;;  %s3387_s13 = inlined_call_operand.vmem [shape: f32[2,1,128], index: 13, kind: input, shape index: {}]   ;;  %s3388_s14 = inlined_call_operand.hbm [shape: f32[2,8,128], index: 14, kind: output, shape index: {}]  }
   0x1   :  { %3421 = sst [smem:[#allocation33_spill]] %s3374_s0 }
   0x2   :  { %3422 = sst [smem:[#allocation34_spill]] %s3375_s1 }
   0x3   :  { %3423 = sst [smem:[#allocation35_spill]] %s3376_s2 }
   0x4   :  { %3424 = sst [smem:[#allocation36_spill]] %s3377_s3 }
   0x5   :  { %3425 = sst [smem:[#allocation37_spill]] %s3378_s4 }
   0x6   :  { %3426 = sst [smem:[#allocation38_spill]] %s3379_s5 }
   0x7   :  { %3427 = sst [smem:[#allocation39_spill]] %s3380_s6 }
   0x8   :  { %3428 = sst [smem:[#allocation40_spill]] %s3381_s7 }
   0x9   :  { %3429 = sst [smem:[#allocation41_spill]] %s3382_s8 }
   0xa   :  { %3430 = sst [smem:[#allocation42_spill]] %s3383_s9 }
   0xb   :  { %3431 = sst [smem:[#allocation43_spill]] %s3384_s10 }
   0xc   :  { %3432 = sst [smem:[#allocation44_spill]] %s3385_s11 }
   0xd   :  { %3433 = sst [smem:[#allocation45_spill]] %s3386_s12 }
   0xe   :  { %3434 = sst [smem:[#allocation46_spill]] %s3387_s13 }
   0xf   :  { %3435 = sst [smem:[#allocation47_spill]] %s3388_s14 }
  0x10   :  { %19 = vsyncpa [#allocation3], 0 }
  0x11   :  { %21 = vsyncpa [#allocation3 + $0x1], 0 }
  0x12   :  { %22 = vsyncpa [#allocation6], 0 }
  0x13   :  { %24 = vsyncpa [#allocation6 + $0x1], 0 }
  0x14   :  { %25 = vsyncpa [#allocation9], 0 }
  0x15   :  { %27 = vsyncpa [#allocation9 + $0x1], 0 }
  0x16   :  { %28 = vsyncpa [#allocation4], 0 }
  0x17   :  { %30 = vsyncpa [#allocation4 + $0x1], 0  ;;  %s2669_s29 = smov 0   ;;  %s2671_s30 = smov 0  }
  0x18   :  { %s2673_s15 = smov 0   ;;  %s2675_s16 = smov 0  }
  0x19   :  { %s2677_s17 = smov 0   ;;  %s2679_s18 = smov 0  }
  0x1a   :  { %s2681_s19 = smov 0   ;;  %s2683_s20 = smov 0  }
  0x1b   :  { %s2685_s21 = smov 0   ;;  %s2687_s22 = smov 0  }
  0x1c   :  { %s2689_s23 = smov 0  }
  0x1d LB: > { %3436 = sst [smem:[#allocation16_spill]] %s2543_s30  ;;  %p3392_p0 = scmp.eq.s32.totalorder %s2579_s23, 0  ;;  %s2579_s23 = sphi %s2689_s23, %s36_s23   ;;  %s2575_s22 = sphi %s2687_s22, %s3526_s22   ;;  %s2571_s21 = sphi %s2685_s21, %s3525_s21   ;;  %s2567_s20 = sphi %s2683_s20, %s3524_s20   ;;  %s2563_s19 = sphi %s2681_s19, %s3523_s19   ;;  %s2559_s18 = sphi %s2679_s18, %s3522_s18   ;;  %s2555_s17 = sphi %s2677_s17, %s3521_s17   ;;  %s2551_s16 = sphi %s2675_s16, %s3520_s16   ;;  %s2547_s15 = sphi %s2673_s15, %s3519_s15   ;;  %s2543_s30 = sphi %s2671_s30, %s3518_s30   ;;  %s2539_s29 = sphi %s2669_s29, %s3517_s29  }
  0x1e   : > { %3437 = sst [smem:[#allocation17_spill]] %s2547_s15  ;;  %p114_p1 = scmp.ne.s32.totalorder %s2547_s15, %s2543_s30 }
  0x1f   : > { %3438 = sst [smem:[#allocation18_spill]] %s2551_s16  ;;  %p3391_p4 = scmp.lt.s32.totalorder %s2579_s23, 4 }
  0x20   : > { %3439 = sst [smem:[#allocation19_spill]] %s2555_s17  ;;  %p116_p3 = por %p114_p1, %p3392_p0 }
  0x21   : > { %3440 = sst [smem:[#allocation20_spill]] %s2559_s18  ;;  %s3390_s27 = sand.u32 1, %s2547_s15  }
  0x22   : > { %3441 = sst [smem:[#allocation21_spill]] %s2563_s19  ;;  %s2156_s28 = smul.u32 384, %s3390_s27 }
  0x23   : > { %3442 = sst [smem:[#allocation22_spill]] %s2567_s20  ;;  %s2157_s14 = smul.u32 6144, %s2571_s21 }
  0x24   : > { %3443 = sst [smem:[#allocation23_spill]] %s2571_s21  ;;  %p2741_p5 = pnand %p3391_p4, %p116_p3 }
  0x25   : > { %3444 = sst [smem:[#allocation24_spill]] %s2575_s22  ;;  %s3447_s2 = sld [smem:[#allocation35_spill]] }
  0x26   : > { %3445 = sst [smem:[#allocation25_spill]] %s2579_s23  ;;  %s484_s26 = scalar_lea.vmem [#allocation5], %s2156_s28 }
  0x27   : > { %s3446_s13 = scalar_select %p2741_p5, 1, 0 }
  0x28   : > { %s491_s9 = sshll.u32 %s484_s26, 4  ;;  %s3448_s27 = sand.u32 1, %s2579_s23   ;;  %s2750_s9 = int_to_ptr.vmem [resolvable:$true] %s491_s9 }
  0x29   : > { %s2755_s8 = scalar_lea.sflag [#allocation6], %s3448_s27  ;;  %p2761_p8 = pneg %p2741_p5 }
  0x2b   : > { %s2748_s25 = scalar_lea.hbm %s3447_s2, %s2157_s14  ;;  %s2304_s26 = scalar_lea.hbm %s3447_s2, 12288 }
  0x2c   : > { %s2299_s3 = scalar_lea.hbm %s2748_s25, 6144  ;;  %p2305_p11 = scmp.lt.u32.totalorder %s2748_s25, %s3447_s2 }
  0x2d   : > { %p2300_p7 = scmp.ne.s32.totalorder %s2748_s25, %s2299_s3  ;;  %p2306_p12 = scmp.lt.u32.totalorder %s2304_s26, %s2299_s3 }
  0x2e   : > { %p2308_p1 = scmp.lt.u32.totalorder %s2299_s3, %s2748_s25 }
  0x2f   : > { %p2302_p9 = pnand %p2761_p8, %p2300_p7  ;;  %p2307_p13 = por %p2306_p12, %p2305_p11 }
  0x31   : > { %p2303_p10 = pneg %p2302_p9  ;;  %p2309_p3 = por %p2308_p1, %p2307_p13 }
  0x33   : > { %p2310_p4 = pnand %p2309_p3, %p2303_p10 }
  0x35   : > { %2313 = shalt.err (!%p2310_p4)
}
  0x36   : > { %s2314_s27 = scalar_lea.vmem %s2750_s9, 6144  ;;  %s2581_s14 = smov [#allocation5]  }
  0x37   : > { %p2315_p7 = scmp.ne.s32.totalorder %s2750_s9, %s2314_s27  ;;  %s2319_s24 = sshll.u32 %s2581_s14, 4  ;;  %s2320_s24 = int_to_ptr.vmem [resolvable:$false] %s2319_s24 }
  0x38   : > { %s2321_s7 = scalar_lea.vmem %s2320_s24, 12288  ;;  %p2322_p0 = scmp.lt.s32.totalorder %s2750_s9, %s2320_s24 }
  0x39   : > { %p2317_p9 = pnand %p2315_p7, %p2761_p8  ;;  %p2323_p6 = scmp.lt.s32.totalorder %s2321_s7, %s2314_s27 }
  0x3b   : > { %p2318_p2 = pneg %p2317_p9  ;;  %p2324_p11 = por %p2323_p6, %p2322_p0 }
  0x3d   : > { %p2325_p12 = pnand %p2324_p11, %p2318_p2 }
  0x3f   : > { %2328 = shalt.err (!%p2325_p12)
}
  0x40   : > { %s2582_s3 = smov 384   ;;  %s2583_s26 = smov 24  }
  0x41   : > { %2178 = dma.hbm_to_vmem [thread:$0]  (!%p2741_p5), %s2748_s25, 6144, %s2750_s9, %s2755_s8, %s2582_s3, %s2582_s3, %s2583_s26  }
  0x42   : > { %p611_p4 = scmp.lt.s32.totalorder %s2579_s23, 5  ;;  %s3450_s28 = sand.u32 1, %s2547_s15  }
  0x43   : > { %s2788_s27 = sshll.u32 %s3450_s28, 7  ;;  %s2791_s14 = sshll.u32 %s2571_s21, 11 }
  0x44   : > { %p3451_p0 = scmp.ge.s32.totalorder %s2579_s23, 1  ;;  %s3453_s10 = sld [smem:[#allocation43_spill]] }
  0x45   : > { %s563_s9 = scalar_lea.vmem [#allocation8], %s2788_s27  ;;  %s3454_s3 = sand.u32 1, %s2579_s23  }
  0x46   : > { %p2795_p2 = pnand %p3451_p0, %p611_p4  ;;  %s570_s25 = sshll.u32 %s563_s9, 4  ;;  %s2806_s25 = int_to_ptr.vmem [resolvable:$true] %s570_s25 }
  0x47   : > { %s2810_s26 = scalar_lea.sflag [#allocation9], %s3454_s3 }
  0x48   : > { %s3452_s24 = scalar_select %p2795_p2, 1, 0 }
  0x4a   : > { %s2803_s6 = scalar_lea.hbm %s3453_s10, %s2791_s14  ;;  %s2334_s7 = scalar_lea.hbm %s3453_s10, 4096 }
  0x4b   : > { %s2329_s28 = scalar_lea.hbm %s2803_s6, 2048  ;;  %p2335_p1 = scmp.lt.u32.totalorder %s2803_s6, %s3453_s10 }
  0x4c   : > { %p2330_p6 = scmp.ne.s32.totalorder %s2803_s6, %s2329_s28  ;;  %p2336_p3 = scmp.lt.u32.totalorder %s2334_s7, %s2329_s28 }
  0x4d   : > { %p2338_p9 = scmp.lt.u32.totalorder %s2329_s28, %s2803_s6 }
  0x4e   : > { %p2332_p10 = pnand %p2330_p6, %p2761_p8  ;;  %p2337_p7 = por %p2336_p3, %p2335_p1 }
  0x50   : > { %p2333_p13 = pneg %p2332_p10  ;;  %p2339_p11 = por %p2338_p9, %p2337_p7 }
  0x52   : > { %p2340_p12 = pnand %p2339_p11, %p2333_p13 }
  0x54   : > { %2343 = shalt.err (!%p2340_p12)
}
  0x55   : > { %s2344_s9 = scalar_lea.vmem %s2806_s25, 2048  ;;  %s2584_s5 = smov [#allocation8]  }
  0x56   : > { %p2345_p4 = scmp.ne.s32.totalorder %s2806_s25, %s2344_s9  ;;  %s2349_s3 = sshll.u32 %s2584_s5, 4  ;;  %s2350_s3 = int_to_ptr.vmem [resolvable:$false] %s2349_s3 }
  0x57   : > { %s2351_s1 = scalar_lea.vmem %s2350_s3, 4096  ;;  %p2352_p10 = scmp.lt.s32.totalorder %s2806_s25, %s2350_s3 }
  0x58   : > { %p2347_p0 = pnand %p2345_p4, %p2761_p8  ;;  %p2353_p2 = scmp.lt.s32.totalorder %s2351_s1, %s2344_s9 }
  0x5a   : > { %p2348_p6 = pneg %p2347_p0  ;;  %p2354_p1 = por %p2353_p2, %p2352_p10 }
  0x5c   : > { %p2355_p3 = pnand %p2354_p1, %p2348_p6 }
  0x5e   : > { %2358 = shalt.err (!%p2355_p3)
}
  0x5f   : > { %s3394_s19 = smov 128   ;;  %s3396_s28 = smov 8  }
  0x60   : > { %2184 = dma.hbm_to_vmem [thread:$0]  (!%p2741_p5), %s2803_s6, 2048, %s2806_s25, %s2810_s26, %s3394_s19, %s3394_s19, %s3396_s28  }
  0x61   : > { %s2838_s2 = sadd.s32 4294967295, %s2579_s23   ;;  %s1768_s7 = sadd.s32 4294967294, %s2579_s23  }
  0x62   : > { %s3455_s9 = sadd.s32 1, %s2571_s21  ;;  %s48_s5 = sadd.s32 1, %s2575_s22 }
  0x63   : > { %p46_p2 = scmp.ge.s32.totalorder %s3455_s9, 2  ;;  %s55_s3 = sadd.s32 1, %s2559_s18 }
  0x64   : > { %s3456_s1 = smov %s3455_s9  ;;  %p62_p13 = scmp.ne.s32.totalorder %s2559_s18, %s2555_s17 }
  0x65   : > { %s3528_s1 = smov (%p46_p2, %s3456_s1), 0  ;;  %s3530_s5 = smov (!%p46_p2, %s48_s5), %s2575_s22 }
  0x66   : > { %3457 = sst [smem:[#allocation26_spill]] %s3528_s1  ;;  %p68_p7 = scmp.ne.s32.totalorder %s2555_s17, %s2551_s16 }
  0x67   : > { %p50_p9 = scmp.ge.s32.totalorder %s3530_s5, 2  ;;  %p69_p11 = scmp.eq.s32.totalorder %s2838_s2, 0 }
  0x68   : > { %p3458_p12 = scmp.eq.s32.totalorder %s2579_s23, 0  ;;  %s104_s25 = ssub.s32 %s2571_s21, %s3528_s1 }
  0x69   : > { %s3532_s5 = smov (%p50_p9, %s3530_s5), 0  ;;  %p2871_p0 = por %p69_p11, %p68_p7 }
  0x6a   : > { %p2860_p4 = por %p3458_p12, %p62_p13  ;;  %3460 = sst [smem:[#allocation27_spill]] %s3532_s5 }
  0x6b   : > { %s3461_s9 = scalar_select %p2871_p0, 1, 0 }
  0x6c   : > { %p105_p6 = scmp.eq.s32.totalorder %s104_s25, 0  ;;  %s52_s19 = ssub.s32 %s2575_s22, %s3532_s5 }
  0x6d   : > { %p3462_p10 = scmp.ne.s32.totalorder %s2543_s30, %s2539_s29  ;;  %p53_p3 = scmp.eq.s32.totalorder %s52_s19, 0 }
  0x6e   : > { %p430_p2 = scmp.eq.s32.totalorder %s2838_s2, 3  ;;  %s3465_s10 = sadd.s32 1, %s2547_s15 }
  0x6f   : > { %p2880_p1 = por %p3462_p10, %p69_p11  ;;  %p436_p12 = scmp.eq.s32.totalorder %s1768_s7, 3 }
  0x70   : > { %s2888_s1 = scalar_select %p105_p6, %s2547_s15, %s3465_s10  }
  0x71   : > { %s3463_s28 = scalar_select %p2880_p1, 1, 0 }
  0x72   : > { %3466 = sst [smem:[#allocation29_spill]] %s2888_s1  ;;  %p2896_p9 = por %p430_p2, %p62_p13 }
  0x73   : > { %3464 = sst [smem:[#allocation28_spill]] %s3463_s28  ;;  %s456_s25 = sand.u32 1, %s2559_s18  }
  0x74   : > { %s2891_s21 = scalar_select %p53_p3, %s2559_s18, %s55_s3  }
  0x75   : > { %s3468_s20 = scalar_select %p2896_p9, 1, 0 }
  0x76   : > { %3467 = sst [smem:[#allocation30_spill]] %s2891_s21  ;;  %s1772_s5 = sshll.u32 %s2575_s22, 7 }
  0x77   : > { %3469 = sst [smem:[#allocation31_spill]] %s3468_s20  ;;  %p2905_p11 = por %p436_p12, %p68_p7 }
  0x78   : > { %s1771_s19 = sshll.u32 %s456_s25, 3  ;;  %s3472_s0 = sld [smem:[#allocation33_spill]] }
  0x79   : > { %s3470_s29 = scalar_select %p2905_p11, 1, 0 }
  0x7a   : > { %p3473_p6 = scmp.lt.s32.totalorder %s2579_s23, 4  ;;  %s460_s3 = scalar_lea.vmem [#allocation2], %s1771_s19 }
  0x7b   : > { %3471 = sst [smem:[#allocation32_spill]] %s3470_s29  ;;  %s467_s22 = sshll.u32 %s460_s3, 4  ;;  %s2922_s22 = int_to_ptr.vmem [resolvable:$true] %s467_s22 }
  0x7c   : > { %p2918_p13 = pnand %p3473_p6, %p2860_p4  ;;  %s457_s21 = scalar_lea.sflag [#allocation3], %s456_s25 }
  0x7e   : > { %s2912_s10 = scalar_lea.hbm %s3472_s0, %s1772_s5  ;;  %p2361_p10 = pneg %p2918_p13 }
  0x7f   : > { %s2359_s30 = scalar_lea.hbm %s2912_s10, 128  ;;  %s2364_s6 = scalar_lea.hbm %s3472_s0, 256 }
  0x80   : > { %p2360_p7 = scmp.ne.s32.totalorder %s2912_s10, %s2359_s30  ;;  %p2365_p4 = scmp.lt.u32.totalorder %s2912_s10, %s3472_s0 }
  0x81   : > { %p2366_p12 = scmp.lt.u32.totalorder %s2364_s6, %s2359_s30  ;;  %p2368_p11 = scmp.lt.u32.totalorder %s2359_s30, %s2912_s10 }
  0x82   : > { %p2362_p3 = pnand %p2361_p10, %p2360_p7 }
  0x83   : > { %p2367_p6 = por %p2366_p12, %p2365_p4 }
  0x84   : > { %p2363_p2 = pneg %p2362_p3 }
  0x85   : > { %p2369_p9 = por %p2368_p11, %p2367_p6 }
  0x87   : > { %p2370_p1 = pnand %p2369_p9, %p2363_p2 }
  0x89   : > { %2373 = shalt.err (!%p2370_p1)
}
  0x8a   : > { %s2374_s25 = scalar_lea.vmem %s2922_s22, 128  ;;  %s2587_s19 = smov [#allocation2]  }
  0x8b   : > { %p2375_p7 = scmp.ne.s32.totalorder %s2922_s22, %s2374_s25  ;;  %s2379_s3 = sshll.u32 %s2587_s19, 4  ;;  %s2380_s3 = int_to_ptr.vmem [resolvable:$false] %s2379_s3 }
  0x8c   : > { %s2381_s18 = scalar_lea.vmem %s2380_s3, 256  ;;  %p2382_p5 = scmp.lt.s32.totalorder %s2922_s22, %s2380_s3 }
  0x8d   : > { %p2377_p3 = pnand %p2375_p7, %p2361_p10  ;;  %p2383_p4 = scmp.lt.s32.totalorder %s2381_s18, %s2374_s25 }
  0x8f   : > { %p2378_p0 = pneg %p2377_p3  ;;  %p2384_p12 = por %p2383_p4, %p2382_p5 }
  0x91   : > { %p2385_p11 = pnand %p2384_p12, %p2378_p0 }
  0x93   : > { %2388 = shalt.err (!%p2385_p11)
}
  0x94   : > { %2175 = dma.hbm_to_vmem [thread:$0]  (!%p2918_p13), %s2912_s10, 128, %s2922_s22, %s457_s21  }
  0x95   : > { %s3475_s4 = sld [smem:[#allocation37_spill]]  ;;  %s512_s5 = scalar_lea.vmem [#allocation7], %s2788_s27 }
  0x96   : > { %s519_s6 = sshll.u32 %s512_s5, 4  ;;  %s2956_s6 = int_to_ptr.vmem [resolvable:$true] %s519_s6 }
  0x9b   : > { %s2953_s28 = scalar_lea.hbm %s3475_s4, %s2791_s14  ;;  %s2394_s22 = scalar_lea.hbm %s3475_s4, 4096 }
  0x9c   : > { %s2389_s7 = scalar_lea.hbm %s2953_s28, 2048  ;;  %p2395_p9 = scmp.lt.u32.totalorder %s2953_s28, %s3475_s4 }
  0x9d   : > { %p2390_p5 = scmp.ne.s32.totalorder %s2953_s28, %s2389_s7  ;;  %p2396_p13 = scmp.lt.u32.totalorder %s2394_s22, %s2389_s7 }
  0x9e   : > { %p2398_p2 = scmp.lt.u32.totalorder %s2389_s7, %s2953_s28 }
  0x9f   : > { %p2392_p0 = pnand %p2390_p5, %p2761_p8  ;;  %p2397_p10 = por %p2396_p13, %p2395_p9 }
  0xa1   : > { %p2393_p1 = pneg %p2392_p0  ;;  %p2399_p6 = por %p2398_p2, %p2397_p10 }
  0xa3   : > { %p2400_p7 = pnand %p2399_p6, %p2393_p1 }
  0xa5   : > { %2403 = shalt.err (!%p2400_p7)
}
  0xa6   : > { %s2404_s3 = scalar_lea.vmem %s2956_s6, 2048  ;;  %s2588_s18 = smov [#allocation7]  }
  0xa7   : > { %p2405_p3 = scmp.ne.s32.totalorder %s2956_s6, %s2404_s3  ;;  %s2409_s1 = sshll.u32 %s2588_s18, 4  ;;  %s2410_s1 = int_to_ptr.vmem [resolvable:$false] %s2409_s1 }
  0xa8   : > { %s2411_s30 = scalar_lea.vmem %s2410_s1, 4096  ;;  %p2412_p11 = scmp.lt.s32.totalorder %s2956_s6, %s2410_s1 }
  0xa9   : > { %p2407_p4 = pnand %p2405_p3, %p2761_p8  ;;  %p2413_p5 = scmp.lt.s32.totalorder %s2411_s30, %s2404_s3 }
  0xab   : > { %p2408_p12 = pneg %p2407_p4  ;;  %p2414_p0 = por %p2413_p5, %p2412_p11 }
  0xad   : > { %p2415_p9 = pnand %p2414_p0, %p2408_p12 }
  0xaf   : > { %2418 = shalt.err (!%p2415_p9)
}
  0xb0   : > { %p3476_p1 = scmp.ne.s32.totalorder %s3446_s13, 0  ;;  %s3477_s5 = smov 8  }
  0xb1   : > { %s3478_s7 = smov 128   ;;  %s3479_s12 = sld [smem:[#allocation45_spill]] }
  0xb2   : > { %2181 = dma.hbm_to_vmem [thread:$0]  (!%p3476_p1), %s2953_s28, 2048, %s2956_s6, %s2755_s8, %s3478_s7, %s3478_s7, %s3477_s5  }
  0xb3   : > { %s590_s10 = scalar_lea.vmem [#allocation10], %s2788_s27 }
  0xb4   : > { %s597_s19 = sshll.u32 %s590_s10, 4  ;;  %s2990_s19 = int_to_ptr.vmem [resolvable:$true] %s597_s19 }
  0xb7   : > { %s2987_s22 = scalar_lea.hbm %s3479_s12, %s2791_s14  ;;  %s2424_s28 = scalar_lea.hbm %s3479_s12, 4096 }
  0xb8   : > { %s2419_s3 = scalar_lea.hbm %s2987_s22, 2048  ;;  %p2425_p6 = scmp.lt.u32.totalorder %s2987_s22, %s3479_s12 }
  0xb9   : > { %p2420_p13 = scmp.ne.s32.totalorder %s2987_s22, %s2419_s3  ;;  %p2426_p7 = scmp.lt.u32.totalorder %s2424_s28, %s2419_s3 }
  0xba   : > { %p2428_p4 = scmp.lt.u32.totalorder %s2419_s3, %s2987_s22 }
  0xbb   : > { %p2422_p10 = pnand %p2420_p13, %p2761_p8  ;;  %p2427_p3 = por %p2426_p7, %p2425_p6 }
  0xbd   : > { %p2423_p2 = pneg %p2422_p10  ;;  %p2429_p12 = por %p2428_p4, %p2427_p3 }
  0xbf   : > { %p2430_p11 = pnand %p2429_p12, %p2423_p2 }
  0xc1   : > { %2433 = shalt.err (!%p2430_p11)
}
  0xc2   : > { %s2434_s27 = scalar_lea.vmem %s2990_s19, 2048  ;;  %s2589_s1 = smov [#allocation10]  }
  0xc3   : > { %p2435_p5 = scmp.ne.s32.totalorder %s2990_s19, %s2434_s27  ;;  %s2439_s30 = sshll.u32 %s2589_s1, 4  ;;  %s2440_s30 = int_to_ptr.vmem [resolvable:$false] %s2439_s30 }
  0xc4   : > { %s2441_s25 = scalar_lea.vmem %s2440_s30, 4096  ;;  %p2442_p13 = scmp.lt.s32.totalorder %s2990_s19, %s2440_s30 }
  0xc5   : > { %p2437_p0 = pnand %p2435_p5, %p2761_p8  ;;  %p2443_p10 = scmp.lt.s32.totalorder %s2441_s25, %s2434_s27 }
  0xc7   : > { %p2438_p9 = pneg %p2437_p0  ;;  %p2444_p6 = por %p2443_p10, %p2442_p13 }
  0xc9   : > { %p2445_p7 = pnand %p2444_p6, %p2438_p9 }
  0xcb   : > { %2448 = shalt.err (!%p2445_p7)
}
  0xcc   : > { %2187 = dma.hbm_to_vmem [thread:$0]  (!%p3476_p1), %s2987_s22, 2048, %s2990_s19, %s2810_s26, %s3478_s7, %s3478_s7, %s3477_s5  }
  0xcd   : > { %p3480_p8 = scmp.ne.s32.totalorder %s3452_s24, 0 }
  0xce   : > { %s3020_s11 = sand.u32 (!%p3480_p8), 1, %s2555_s17   ;;  %p3481_p2 = scmp.ne.s32.totalorder (!%p3480_p8), %s3461_s9, 0 }
  0xcf   : > { %615 = sbr.rel (%p3480_p8) target bundleno = 2229 (0x8b5), region = 76  ;;  %s3412_s21 = sshll.u32 (!%p3480_p8), %s3020_s11, 3 }
  0xd0   : > { %s618_s10 = scalar_lea.sflag (!%p3480_p8), [#allocation3], %s3020_s11  ;;  %s3026_s13 = scalar_lea.vmem (!%p3480_p8), [#allocation2], %s3412_s21 }
  0xd6   : > { %2522 = dma.done.wait (%p3481_p2), %s618_s10, 128  }
  0xd7   : > { %2524 = vsyncadd (%p3481_p2), %s618_s10, 4294967168  ;;  %s3482_s24 = sld [smem:[#allocation16_spill]]  ;;  %s3483_s26 = sld [smem:[#allocation28_spill]] }
  0xd8   : > { %s626_s5 = sand.u32 1, %s2838_s2  }
  0xd9   : > { %s627_s19 = scalar_lea.sflag [#allocation6], %s626_s5 }
  0xdd   : > { %s628_s7 = sand.u32 1, %s3482_s24   ;;  %p3484_p1 = scmp.ne.s32.totalorder %s3483_s26, 0 }
  0xde   : > { %s2158_s22 = smul.u32 384, %s628_s7 }
  0xe0   : > { %s3034_s3 = scalar_lea.vmem [#allocation5], %s2158_s22 }
  0xe1   : > { %2526 = dma.done.wait (%p3484_p1), %s627_s19, 8192  }
  0xe2   : > { %2528 = vsyncadd (%p3484_p1), %s627_s19, 4294959104  ;;  %s1785_s18 = sshll.u32 %s628_s7, 7  ;;  %s645_s9 = scalar_lea.sflag [#allocation9], %s626_s5 }
  0xe3   : > { %s3040_s8 = scalar_lea.vmem [#allocation7], %s1785_s18  ;;  %s3042_s28 = scalar_lea.vmem [#allocation8], %s1785_s18 }
  0xe4   : > { %2530 = dma.done.wait (%p3484_p1), %s645_s9, 4096  }
  0xe5   : > { %2532 = vsyncadd (%p3484_p1), %s645_s9, 4294963200  ;;  %s3485_s2 = sld [smem:[#allocation22_spill]]  ;;  %s3486_s6 = sld [smem:[#allocation21_spill]] }
  0xe6   : > { %s3491_s15 = sld [smem:[#allocation36_spill]]  ;;  %s3492_s25 = sld [smem:[#allocation41_spill]] }
  0xe7   : > { %s3493_s26 = sld [smem:[#allocation42_spill]]  ;;  %s3494_s19 = sld [smem:[#allocation44_spill]] }
  0xe8   : > { %s3495_s27 = sld [smem:[#allocation46_spill]]  ;;  %s3094_s4 = scalar_lea.vmem [#allocation10], %s1785_s18 }
  0xe9   : > { %s3496_s12 = sshll.u32 %s3020_s11, 3 }
  0xeb   : > { %p750_p3 = scmp.lt.s32.totalorder %s3485_s2, 1  ;;  %p753_p4 = scmp.lt.s32.totalorder %s3486_s6, 1 }
  0xec   : > { %p1789_p12 = scmp.ne.s32.totalorder %s3486_s6, 0 }
  0xed   : > { %s3534_s2 = smov (!%p750_p3, %s3485_s2), 1  ;;  %v782_v0 = vld [vmem:[%s3026_s13] sm:$0xff] (!%p1789_p12) }
  0xee   : > { %s3054_s14 = scalar_select %p753_p4, %s3486_s6, 1 }
  0xef   : > { %781 = sbr.rel (%p1789_p12) target bundleno = 246 (0xf6), region = 100 }
  0xf0   : > { %s2159_s10 = smul.u32 3, %s3054_s14  ;;  %s768_s23 = scalar_lea.vmem %s3492_s25, %s3054_s14 }
  0xf1   : > { %s771_s5 = scalar_lea.vmem %s3493_s26, %s3054_s14  ;;  %s774_s9 = scalar_lea.vmem %s3494_s19, %s3054_s14 }
  0xf2   : > { %s3076_s29 = scalar_lea.vmem %s3491_s15, %s2159_s10  ;;  %s777_s1 = scalar_lea.vmem %s3495_s27, %s3054_s14 }
  0xf3   : > { %s3098_s15 = scalar_lea.vmem [#allocation11], %s3496_s12 }
  0xf4   : > { %783 = vst [vmem:[%s3098_s15] sm:$0xff] (!%p1789_p12), %v782_v0 }
  0xf6 PF: > { %v817_v2 = vld [vmem:[%s3034_s3 + $0x8] sm:$0xff]  ;;  %v820_v3 = vld [vmem:[%s3034_s3 + $0x20] sm:$0xff]  ;;  %v2590_v6 = vmov 0.0|0.0   ;;  %v819_v8 = vld [vmem:[%s3034_s3 + $0x18] sm:$0xff]  ;;  %v2591_v55 = vmov 0.0   ;;  %vm2592_vm0 = vmmov 0  }
  0xf7   : > { %v2028_v5 = vpack.c.bf16 %v820_v3, %v817_v2  ;;  %2060 = vmatprep.subr.bf16.mxu1 %v2590_v6  ;;  %v816_v7 = vld [vmem:[%s3034_s3] sm:$0xff]  ;;  %v818_v9 = vld [vmem:[%s3034_s3 + $0x10] sm:$0xff]  ;;  %v821_v11 = vld [vmem:[%s3034_s3 + $0x28] sm:$0xff]  ;;  %945 = vmatprep.mubr.f32.mxu0 %v2591_v55  ;;  %s3497_s20 = sld [smem:[#allocation39_spill]]  ;;  %s3499_s18 = sld [smem:[#allocation40_spill]]  ;;  %vm1100_vm1 = vcmask 64512  }
  0xf8   : > { %v2030_v10 = vpack.c.bf16 %v819_v8, %v816_v7  ;;  %v2061_v12 = vpack.c.bf16 %v821_v11, %v818_v9  ;;  %v823_v13 = vld [vmem:[%s3034_s3 + $0x38] sm:$0xff]  ;;  %v826_v14 = vld [vmem:[%s3034_s3 + $0x50] sm:$0xff]  ;;  %v825_v17 = vld [vmem:[%s3034_s3 + $0x48] sm:$0xff]  ;;  %1910 = vmatprep.mubr.msk.f32.mxu1 %vm2592_vm0, %v2591_v55  ;;  %s3501_s10 = sld [smem:[#allocation34_spill]]  ;;  %s3503_s30 = sld [smem:[#allocation38_spill]] }
  0xf9   : > { %2029 = vmatprep.subr.bf16.mxu0 %v2028_v5  ;;  %v2032_v15 = vpack.c.bf16 %v826_v14, %v823_v13  ;;  %v822_v16 = vld [vmem:[%s3034_s3 + $0x30] sm:$0xff]  ;;  %v824_v18 = vld [vmem:[%s3034_s3 + $0x40] sm:$0xff]  ;;  %v827_v20 = vld [vmem:[%s3034_s3 + $0x58] sm:$0xff]  ;;  %s1516_s13 = sshll.u32 %s3098_s15, 4  ;;  %s2593_s25 = smov [#allocation11]   ;;  %s3312_s13 = int_to_ptr.vmem [resolvable:$true] %s1516_s13 }
  0xfa   : > { %2031 = vmatpush1.bf16.msra.mxu0 %v2030_v10  ;;  %2062 = vmatpush3.bf16.msra.mxu1 %v2061_v12  ;;  %v2034_v19 = vpack.c.bf16 %v825_v17, %v822_v16  ;;  %v2064_v21 = vpack.c.bf16 %v827_v20, %v824_v18  ;;  %v829_v22 = vld [vmem:[%s3034_s3 + $0x68] sm:$0xff]  ;;  %v832_v23 = vld [vmem:[%s3034_s3 + $0x80] sm:$0xff]  ;;  %v831_v26 = vld [vmem:[%s3034_s3 + $0x78] sm:$0xff] }
  0xfb   : > { %v3104_v1 = vld [vmem:[%s3098_s15] sm:$0xff]  ;;  %2063 = vmatprep.subr.bf16.mxu1 %v2590_v6  ;;  %2033 = vmatprep.subr.bf16.mxu0 %v2032_v15  ;;  %v2036_v24 = vpack.c.bf16 %v832_v23, %v829_v22  ;;  %v830_v27 = vld [vmem:[%s3034_s3 + $0x70] sm:$0xff]  ;;  %v835_v31 = vld [vmem:[%s3034_s3 + $0x98] sm:$0xff] }
  0xfc   : > { %788 = vadd.xlane.f32.xlu0 %v3104_v1  ;;  %v791_v4 = vmul.f32 %v3104_v1, %v3104_v1  ;;  %v828_v25 = vld [vmem:[%s3034_s3 + $0x60] sm:$0xff]  ;;  %v833_v29 = vld [vmem:[%s3034_s3 + $0x88] sm:$0xff]  ;;  %v838_v32 = vld [vmem:[%s3034_s3 + $0xb0] sm:$0xff] }
  0xfd   : > { %v2038_v28 = vpack.c.bf16 %v831_v26, %v828_v25  ;;  %v2067_v30 = vpack.c.bf16 %v833_v29, %v830_v27  ;;  %v2040_v33 = vpack.c.bf16 %v838_v32, %v835_v31  ;;  %v834_v34 = vld [vmem:[%s3034_s3 + $0x90] sm:$0xff]  ;;  %v837_v35 = vld [vmem:[%s3034_s3 + $0xa8] sm:$0xff]  ;;  %v836_v36 = vld [vmem:[%s3034_s3 + $0xa0] sm:$0xff]  ;;  %s3498_s21 = scalar_lea.vmem %s3497_s20, %s3054_s14  ;;  %s3500_s6 = scalar_lea.vmem %s3499_s18, %s3054_s14 }
  0xfe   : > { %2035 = vmatpush1.bf16.msra.mxu0 %v2034_v19  ;;  %2065 = vmatpush3.bf16.msra.mxu1 %v2064_v21  ;;  %v2042_v37 = vpack.c.bf16 %v837_v35, %v834_v34  ;;  %v839_v38 = vld [vmem:[%s3034_s3 + $0xb8] sm:$0xff]  ;;  %v841_v40 = vld [vmem:[%s3034_s3 + $0xc8] sm:$0xff]  ;;  %v844_v41 = vld [vmem:[%s3034_s3 + $0xe0] sm:$0xff]  ;;  %s3502_s7 = scalar_lea.vmem %s3501_s10, %s3534_s2  ;;  %s3504_s24 = scalar_lea.vmem %s3503_s30, %s3054_s14 }
  0xff   : > { %2066 = vmatprep.subr.bf16.mxu1 %v2590_v6  ;;  %2037 = vmatprep.subr.bf16.mxu0 %v2036_v24  ;;  %v2070_v39 = vpack.c.bf16 %v839_v38, %v836_v36  ;;  %v2044_v42 = vpack.c.bf16 %v844_v41, %v841_v40  ;;  %v840_v43 = vld [vmem:[%s3034_s3 + $0xc0] sm:$0xff]  ;;  %v843_v44 = vld [vmem:[%s3034_s3 + $0xd8] sm:$0xff]  ;;  %v842_v45 = vld [vmem:[%s3034_s3 + $0xd0] sm:$0xff]  ;;  %s1503_s14 = scalar_lea.sflag [#allocation4], %s3020_s11  ;;  %s2453_s10 = sshll.u32 %s2593_s25, 4  ;;  %s2454_s10 = int_to_ptr.vmem [resolvable:$false] %s2453_s10 }
 0x100   : > { %792 = vadd.xlane.f32.xlu0 %v791_v4  ;;  %v2046_v46 = vpack.c.bf16 %v843_v44, %v840_v43  ;;  %v845_v47 = vld [vmem:[%s3034_s3 + $0xe8] sm:$0xff]  ;;  %v847_v48 = vld [vmem:[%s3034_s3 + $0xf8] sm:$0xff]  ;;  %v850_v49 = vld [vmem:[%s3034_s3 + $0x110] sm:$0xff]  ;;  %p2456_p13 = scmp.lt.s32.totalorder %s3312_s13, %s2454_s10 }
 0x101   : > { %v2073_v50 = vpack.c.bf16 %v845_v47, %v842_v45  ;;  %v2048_v51 = vpack.c.bf16 %v850_v49, %v847_v48  ;;  %v846_v52 = vld [vmem:[%s3034_s3 + $0xf0] sm:$0xff]  ;;  %v849_v53 = vld [vmem:[%s3034_s3 + $0x108] sm:$0xff]  ;;  %v848_v54 = vld [vmem:[%s3034_s3 + $0x100] sm:$0xff] }
 0x102   : > { %2039 = vmatpush1.bf16.msra.mxu0 %v2038_v28  ;;  %2068 = vmatpush3.bf16.msra.mxu1 %v2067_v30  ;;  %v2050_v56 = vpack.c.bf16 %v849_v53, %v846_v52  ;;  %v851_v57 = vld [vmem:[%s3034_s3 + $0x118] sm:$0xff]  ;;  %v853_v58 = vld [vmem:[%s3034_s3 + $0x128] sm:$0xff]  ;;  %v856_v59 = vld [vmem:[%s3034_s3 + $0x140] sm:$0xff]  ;;  %v866_v30 = vlaneseq }
 0x103   : > { %2069 = vmatprep.subr.bf16.mxu1 %v2590_v6  ;;  %2041 = vmatprep.subr.bf16.mxu0 %v2040_v33  ;;  %v2076_v60 = vpack.c.bf16 %v851_v57, %v848_v54  ;;  %v2052_v61 = vpack.c.bf16 %v856_v59, %v853_v58  ;;  %v852_v62 = vld [vmem:[%s3034_s3 + $0x120] sm:$0xff]  ;;  %v855_v63 = vld [vmem:[%s3034_s3 + $0x138] sm:$0xff]  ;;  %v854_v0 = vld [vmem:[%s3034_s3 + $0x130] sm:$0xff] }
 0x104   : > { %v857_v2 = vld [vmem:[%s3034_s3 + $0x148] sm:$0xff]  ;;  %v859_v3 = vld [vmem:[%s3034_s3 + $0x158] sm:$0xff]  ;;  %v862_v4 = vld [vmem:[%s3034_s3 + $0x170] sm:$0xff]  ;;  %v2054_v5 = vpack.c.bf16 %v855_v63, %v852_v62  ;;  %v867_v31 = vshrl.u32 %v866_v30, 7 }
 0x105   : > { %v2079_v7 = vpack.c.bf16 %v857_v2, %v854_v0  ;;  %v2056_v8 = vpack.c.bf16 %v862_v4, %v859_v3  ;;  %v858_v9 = vld [vmem:[%s3034_s3 + $0x150] sm:$0xff]  ;;  %v861_v10 = vld [vmem:[%s3034_s3 + $0x168] sm:$0xff]  ;;  %v860_v11 = vld [vmem:[%s3034_s3 + $0x160] sm:$0xff] }
 0x106   : > { %2043 = vmatpush1.bf16.msra.mxu0 %v2042_v37  ;;  %2071 = vmatpush3.bf16.msra.mxu1 %v2070_v39  ;;  %v863_v12 = vld [vmem:[%s3034_s3 + $0x178] sm:$0xff]  ;;  %v2058_v13 = vpack.c.bf16 %v861_v10, %v858_v9  ;;  %v1790_v25 = vld [vmem:[%s3498_s21] ss:$0 sm:$0xff]  ;;  %v872_v32 = vsub.s32 1, %v867_v31  ;;  %v868_v34 = vsub.s32 0, %v867_v31  ;;  %v876_v35 = vsub.s32 2, %v867_v31 }
 0x107   : > { %2072 = vmatprep.subr.bf16.mxu1 %v2590_v6  ;;  %2045 = vmatprep.subr.bf16.mxu0 %v2044_v42  ;;  %v2082_v14 = vpack.c.bf16 %v863_v12, %v860_v11  ;;  %v1791_v27 = vld [vmem:[%s3500_s6] ss:$0 sm:$0xff]  ;;  %v1185_v58 = vld [vmem:[%s3040_s8] sm:$0xff]  ;;  %v1186_v59 = vld [vmem:[%s3040_s8 + $0x8] sm:$0xff]  ;;  %s3511_s6 = sld [smem:[#allocation47_spill]] }
 0x108   : > { %v864_v33 = vld [vmem:[%s3076_s29] sm:$0x7]  ;;  %v1188_v62 = vld [vmem:[%s3040_s8 + $0x18] sm:$0xff]  ;;  %v1189_v0 = vld [vmem:[%s3040_s8 + $0x20] sm:$0xff] }
 0x109   : > { %v873_v36 = vrot.slane %v864_v33, %v872_v32  ;;  %v869_v39 = vrot.slane %v864_v33, %v868_v34  ;;  %v877_v42 = vrot.slane %v864_v33, %v876_v35  ;;  %v1792_v47 = vld [vmem:[%s3502_s7] ss:$0 sm:$0xff]  ;;  %v1190_v2 = vld [vmem:[%s3040_s8 + $0x28] sm:$0xff]  ;;  %v1196_v12 = vld [vmem:[%s3040_s8 + $0x58] sm:$0xff]  ;;  %s2455_s7 = scalar_lea.vmem %s2454_s10, 256 }
 0x10a   : > { %2047 = vmatpush1.bf16.msra.mxu0 %v2046_v46  ;;  %2074 = vmatpush3.bf16.msra.mxu1 %v2073_v50  ;;  %v2091_v3 = vpack.c.bf16 %v1190_v2, %v1189_v0  ;;  %v1191_v4 = vld [vmem:[%s3040_s8 + $0x30] sm:$0xff]  ;;  %v1194_v9 = vld [vmem:[%s3040_s8 + $0x48] sm:$0xff]  ;;  %v1312_v34 = vld [vmem:[%s3042_s28 + $0x18] sm:$0xff] }
 0x10b   : > { %2049 = vmatprep.subr.bf16.mxu0 %v2048_v51  ;;  %2075 = vmatprep.subr.bf16.mxu1 %v2590_v6  ;;  %v1195_v11 = vld [vmem:[%s3040_s8 + $0x50] sm:$0xff] }
 0x10c   : > { %v1311_v33 = vld [vmem:[%s3042_s28 + $0x10] sm:$0xff] }
 0x10d   : > { %v2112_v35 = vpack.c.bf16 %v1312_v34, %v1311_v33 }
 0x10e   : > { %2051 = vmatpush1.bf16.msra.mxu0 %v2050_v56  ;;  %2077 = vmatpush3.bf16.msra.mxu1 %v2076_v60  ;;  %v1187_v60 = vld [vmem:[%s3040_s8 + $0x10] sm:$0xff] }
 0x10f   : > { %2053 = vmatprep.subr.bf16.mxu0 %v2052_v61  ;;  %2078 = vmatprep.subr.bf16.mxu1 %v2590_v6  ;;  %v2085_v61 = vpack.c.bf16 %v1186_v59, %v1185_v58  ;;  %v2088_v63 = vpack.c.bf16 %v1188_v62, %v1187_v60  ;;  %v1410_v58 = vld [vmem:[%s3094_s4 + $0x18] sm:$0xff]  ;;  %v1411_v60 = vld [vmem:[%s3094_s4 + $0x20] sm:$0xff] }
 0x112   : > { %2055 = vmatpush1.bf16.msra.mxu0 %v2054_v5  ;;  %2080 = vmatpush3.bf16.msra.mxu1 %v2079_v7  ;;  %v1192_v5 = vld [vmem:[%s3040_s8 + $0x38] sm:$0xff] }
 0x113   : > { %2057 = vmatprep.subr.bf16.mxu0 %v2056_v8  ;;  %2081 = vmatprep.subr.bf16.mxu1 %v2590_v6  ;;  %v2094_v7 = vpack.c.bf16 %v1192_v5, %v1191_v4  ;;  %v1193_v8 = vld [vmem:[%s3040_s8 + $0x40] sm:$0xff] }
 0x114   : > { %v2097_v10 = vpack.c.bf16 %v1194_v9, %v1193_v8 }
 0x116   : > { %2059 = vmatpush1.bf16.msra.mxu0 %v2058_v13  ;;  %2083 = vmatpush3.bf16.msra.mxu1 %v2082_v14  ;;  %v2100_v13 = vpack.c.bf16 %v1196_v12, %v1195_v11  ;;  %v1197_v14 = vld [vmem:[%s3040_s8 + $0x60] sm:$0xff]  ;;  %v1795_v11 = vld [vmem:[%s768_s23] ss:$0 sm:$0xff]  ;;  %s3507_s23 = sld [smem:[#allocation22_spill]] }
 0x117   : > { %2084 = vmatprep.subr.bf16.mxu0 %v2590_v6  ;;  %1913 = vmatprep.subr.mxu1 %v2591_v55 }
 0x189   : > { %v789_v15 = vpop.xlane.xlu0 %788 }
 0x18a   : > { %v790_v16 = vmul.f32 0.03125, %v789_v15  ;;  %v1198_v15 = vld [vmem:[%s3040_s8 + $0x68] sm:$0xff] }
 0x18c   : > { %v795_v18 = vmul.f32 %v790_v16, %v790_v16  ;;  %v798_v23 = vsub.f32 %v3104_v1, %v790_v16  ;;  %v2103_v16 = vpack.c.bf16 %v1198_v15, %v1197_v14 }
 0x18d   : > { %v793_v17 = vpop.xlane.xlu0 %792 }
 0x18e   : > { %v794_v19 = vmul.f32 0.03125, %v793_v17  ;;  %v1199_v17 = vld [vmem:[%s3040_s8 + $0x70] sm:$0xff] }
 0x190   : > { %v796_v20 = vsub.f32 %v794_v19, %v795_v18  ;;  %v1200_v18 = vld [vmem:[%s3040_s8 + $0x78] sm:$0xff] }
 0x191   : > { %v2106_v19 = vpack.c.bf16 %v1200_v18, %v1199_v17  ;;  %v1414_v17 = vld [vmem:[%s3094_s4 + $0x38] sm:$0xff] }
 0x192   : > { %v797_v21 = vmax.f32 %v796_v20, 0.0 }
 0x194   : > { %v799_v22 = vadd.f32 1e-05, %v797_v21 }
 0x196   : > { %2289 = vrsqrt.f32 %v799_v22 }
 0x1a0   : > { %v2290_v24 = vpop.eup %2289 }
 0x1a1   : > { %v801_v26 = vmul.f32 %v2290_v24, %v798_v23 }
 0x1a3   : > { %v808_v28 = vmul.f32 %v1790_v25, %v801_v26  ;;  %v1309_v25 = vld [vmem:[%s3042_s28] sm:$0xff]  ;;  %v1310_v26 = vld [vmem:[%s3042_s28 + $0x8] sm:$0xff] }
 0x1a5   : > { %v815_v29 = vadd.f32 %v1791_v27, %v808_v28  ;;  %v2109_v27 = vpack.c.bf16 %v1310_v26, %v1309_v25  ;;  %v1794_v28 = vld [vmem:[%s3504_s24] ss:$0 sm:$0xff]  ;;  %v1419_v25 = vld [vmem:[%s3094_s4 + $0x60] sm:$0xff]  ;;  %v1420_v26 = vld [vmem:[%s3094_s4 + $0x68] sm:$0xff] }
 0x1a7   : > { %946 = vmatmul.mubr.f32.vlgmr.msra.gmra.mrb[0].mxu0 %v815_v29  ;;  %1911 = vmatmul.mubr.f32.vlgmr.msra.gmra.mrb[0].mxu1 %v815_v29 }
 0x1a8   : > { %1915 = vmatprep.mubr.msk.f32.mxu1 %vm2592_vm0, %v2591_v55  ;;  %1955 = vmatprep.mubr.msk.f32.mxu0 %vm2592_vm0, %v2591_v55 }
 0x1a9   : > { %2086 = vmatpush3.bf16.msra.mxu0 %v2085_v61  ;;  %v1412_v61 = vld [vmem:[%s3094_s4 + $0x28] sm:$0xff] }
 0x1aa   : > { %2087 = vmatprep.subr.bf16.mxu0 %v2590_v6  ;;  %v2139_v62 = vpack.c.bf16 %v1412_v61, %v1411_v60 }
 0x1ad   : > { %2089 = vmatpush3.bf16.msra.mxu0 %v2088_v63 }
 0x1ae   : > { %2090 = vmatprep.subr.bf16.mxu0 %v2590_v6 }
 0x1b1   : > { %2092 = vmatpush3.bf16.msra.mxu0 %v2091_v3 }
 0x1b2   : > { %2093 = vmatprep.subr.bf16.mxu0 %v2590_v6 }
 0x1b5   : > { %2095 = vmatpush3.bf16.msra.mxu0 %v2094_v7 }
 0x1b6   : > { %2096 = vmatprep.subr.bf16.mxu0 %v2590_v6 }
 0x1b9   : > { %2098 = vmatpush3.bf16.msra.mxu0 %v2097_v10 }
 0x1ba   : > { %2099 = vmatprep.subr.bf16.mxu0 %v2590_v6 }
 0x1bd   : > { %2101 = vmatpush3.bf16.msra.mxu0 %v2100_v13  ;;  %v1796_v13 = vld [vmem:[%s771_s5] ss:$0 sm:$0xff] }
 0x1be   : > { %2102 = vmatprep.subr.bf16.mxu0 %v2590_v6 }
 0x1c1   : > { %2104 = vmatpush3.bf16.msra.mxu0 %v2103_v16  ;;  %v1413_v16 = vld [vmem:[%s3094_s4 + $0x30] sm:$0xff] }
 0x1c2   : > { %2105 = vmatprep.subr.bf16.mxu0 %v2590_v6  ;;  %v2142_v18 = vpack.c.bf16 %v1414_v17, %v1413_v16 }
 0x1c5   : > { %2107 = vmatpush3.bf16.msra.mxu0 %v2106_v19  ;;  %v1415_v19 = vld [vmem:[%s3094_s4 + $0x40] sm:$0xff] }
 0x1c6   : > { %2132 = vmatprep.subr.bf16.mxu0 %v2590_v6 }
 0x27a   : > { %v947_v37 = vpop.f32.mrb[0].mxu0  ;;  %v1018_v38 = vpop.f32.mrb[0].mxu1 }
 0x27b   : > { %v949_v40 = vpop.f32.mrb[1].mxu0  ;;  %v1912_v41 = vpop.f32.mrb[1].mxu1  ;;  %v948_v44 = vadd.f32 %v947_v37, %v869_v39  ;;  %v1019_v45 = vadd.f32 %v1018_v38, %v877_v42  ;;  %v1314_v37 = vld [vmem:[%s3042_s28 + $0x28] sm:$0xff]  ;;  %v1315_v38 = vld [vmem:[%s3042_s28 + $0x30] sm:$0xff]  ;;  %v1316_v39 = vld [vmem:[%s3042_s28 + $0x38] sm:$0xff] }
 0x27c   : > { %v950_v43 = vadd.f32 %v949_v40, %v873_v36  ;;  %v1313_v36 = vld [vmem:[%s3042_s28 + $0x20] sm:$0xff]  ;;  %v2118_v40 = vpack.c.bf16 %v1316_v39, %v1315_v38  ;;  %v1318_v42 = vld [vmem:[%s3042_s28 + $0x48] sm:$0xff]  ;;  %v1798_v38 = vld [vmem:[%s777_s1] ss:$0 sm:$0xff]  ;;  %s2449_s1 = scalar_lea.vmem %s3312_s13, 128 }
 0x27d   : > { %v1317_v41 = vld [vmem:[%s3042_s28 + $0x40] sm:$0xff]  ;;  %p2450_p11 = scmp.ne.s32.totalorder %s3312_s13, %s2449_s1  ;;  %p2457_p10 = scmp.lt.s32.totalorder %s2455_s7, %s2449_s1 }
 0x27e   : > { %1914 = vmatpush3.xpose.msra.mxu1 %v950_v43  ;;  %v2121_v43 = vpack.c.bf16 %v1318_v42, %v1317_v41 }
 0x27f   : > { %1918 = vmatprep.subr.mxu1 %v2591_v55  ;;  %p2458_p6 = por %p2457_p10, %p2456_p13 }
 0x281   : > { %1916 = vmatmul.mubr.f32.vlgmr.msra.gmra.mrb[2].mxu1 %v948_v44  ;;  %v1319_v44 = vld [vmem:[%s3042_s28 + $0x50] sm:$0xff] }
 0x282   : > { %1919 = vmatpush3.msra.mxu1 %v1019_v45  ;;  %1920 = vmatprep.mubr.msk.f32.mxu1 %vm2592_vm0, %v2591_v55  ;;  %v1320_v45 = vld [vmem:[%s3042_s28 + $0x58] sm:$0xff] }
 0x283   : > { %2108 = vmatprep.subr.bf16.mxu1 %v2590_v6 }
 0x354   : > { %v1088_v46 = vpop.f32.mrb[2].mxu1 }
 0x355   : > { %v1092_v48 = vmul.f32 0.17677669, %v1088_v46  ;;  %v1917_v49 = vpop.f32.mrb[3].mxu1  ;;  %v2124_v46 = vpack.c.bf16 %v1320_v45, %v1319_v44 }
 0x357   : > { %v1099_v50 = vadd.f32 %v1792_v47, %v1092_v48  ;;  %v1321_v47 = vld [vmem:[%s3042_s28 + $0x60] sm:$0xff]  ;;  %v1322_v48 = vld [vmem:[%s3042_s28 + $0x68] sm:$0xff] }
 0x358   : > { %v2127_v49 = vpack.c.bf16 %v1322_v48, %v1321_v47 }
 0x359   : > { %v1101_v51 = vsel %vm1100_vm1, %v1099_v50, -inf }
 0x35a   : > { %1102 = vmax.xlane.f32.xlu1 %v1101_v51  ;;  %v1324_v51 = vld [vmem:[%s3042_s28 + $0x78] sm:$0xff] }
 0x3e7   : > { %v1103_v52 = vpop.xlane.xlu1 %1102 }
 0x3e8   : > { %v1104_v53 = vsub.f32 %v1099_v50, %v1103_v52  ;;  %v1323_v50 = vld [vmem:[%s3042_s28 + $0x70] sm:$0xff] }
 0x3e9   : > { %v2130_v52 = vpack.c.bf16 %v1324_v51, %v1323_v50 }
 0x3ea   : > { %v1105_v54 = vmul.f32 1.442695, %v1104_v53  ;;  %v1407_v53 = vld [vmem:[%s3094_s4] sm:$0xff] }
 0x3ec   : > { %2291 = vpow2.f32 %v1105_v54  ;;  %v1408_v54 = vld [vmem:[%s3094_s4 + $0x8] sm:$0xff] }
 0x3f6   : > { %v2292_v56 = vpop.eup %2291 }
 0x3f7   : > { %v1107_v57 = vsel %vm1100_vm1, %v2292_v56, 0.0 }
 0x3f8   : > { %1108 = vadd.xlane.f32.xlu1 %v1107_v57  ;;  %v2133_v57 = vpack.c.bf16 %v1408_v54, %v1407_v53 }
 0x485   : > { %v1109_v20 = vpop.xlane.xlu1 %1108 }
 0x486   : > { %2293 = vrcp.f32 %v1109_v20  ;;  %v1416_v20 = vld [vmem:[%s3094_s4 + $0x48] sm:$0xff] }
 0x490   : > { %v2294_v21 = vpop.eup %2293 }
 0x491   : > { %v1111_v22 = vmul.f32 %v2294_v21, %v2292_v56  ;;  %v1409_v56 = vld [vmem:[%s3094_s4 + $0x10] sm:$0xff]  ;;  %v2145_v21 = vpack.c.bf16 %v1416_v20, %v1415_v19 }
 0x492   : > { %v2136_v59 = vpack.c.bf16 %v1410_v58, %v1409_v56 }
 0x493   : > { %1921 = vmatmul.mubr.msk.f32.vlgmr.msra.gmra.mrb[4].mxu1 %vm1100_vm1, %v1111_v22  ;;  %v1417_v22 = vld [vmem:[%s3094_s4 + $0x50] sm:$0xff] }
 0x494   : > { %1990 = vmatprep.mubr.msk.f32.mxu1 %vm2592_vm0, %v2591_v55  ;;  %2110 = vmatpush3.bf16.msra.mxu1 %v2109_v27  ;;  %v2151_v27 = vpack.c.bf16 %v1420_v26, %v1419_v25 }
 0x495   : > { %2111 = vmatprep.subr.bf16.mxu1 %v2590_v6 }
 0x498   : > { %2113 = vmatpush3.bf16.msra.mxu1 %v2112_v35 }
 0x499   : > { %2114 = vmatprep.subr.bf16.mxu1 %v2590_v6 }
 0x566   : > { %v1181_v23 = vpop.f32.mrb[4].mxu1 }
 0x567   : > { %v1922_v24 = vpop.f32.mrb[5].mxu1  ;;  %1956 = vmatmul.mubr.f32.vlgmr.msra.gmra.mrb[2].mxu0 %v1181_v23  ;;  %v1418_v23 = vld [vmem:[%s3094_s4 + $0x58] sm:$0xff] }
 0x568   : > { %2025 = vmatprep.mubr.msk.f32.mxu0 %vm2592_vm0, %v2591_v55  ;;  %2134 = vmatpush3.bf16.msra.mxu0 %v2133_v57  ;;  %v2148_v24 = vpack.c.bf16 %v1418_v23, %v1417_v22 }
 0x569   : > { %2135 = vmatprep.subr.bf16.mxu0 %v2590_v6 }
 0x56c   : > { %2137 = vmatpush3.bf16.msra.mxu0 %v2136_v59 }
 0x56d   : > { %2138 = vmatprep.subr.bf16.mxu0 %v2590_v6 }
 0x570   : > { %2140 = vmatpush3.bf16.msra.mxu0 %v2139_v62 }
 0x571   : > { %2141 = vmatprep.subr.bf16.mxu0 %v2590_v6 }
 0x574   : > { %2143 = vmatpush3.bf16.msra.mxu0 %v2142_v18 }
 0x575   : > { %2144 = vmatprep.subr.bf16.mxu0 %v2590_v6 }
 0x578   : > { %2146 = vmatpush3.bf16.msra.mxu0 %v2145_v21 }
 0x579   : > { %2147 = vmatprep.subr.bf16.mxu0 %v2590_v6 }
 0x57c   : > { %2149 = vmatpush3.bf16.msra.mxu0 %v2148_v24 }
 0x57d   : > { %2150 = vmatprep.subr.bf16.mxu0 %v2590_v6 }
 0x580   : > { %2152 = vmatpush3.bf16.msra.mxu0 %v2151_v27 }
 0x581   : > { %2153 = vmatprep.subr.bf16.mxu0 %v2590_v6 }
 0x63a   : > { %v1274_v29 = vpop.f32.mrb[2].mxu0 }
 0x63b   : > { %v1275_v30 = vadd.f32 %v1794_v28, %v1274_v29  ;;  %v1957_v31 = vpop.f32.mrb[3].mxu0  ;;  %v1421_v28 = vld [vmem:[%s3094_s4 + $0x70] sm:$0xff]  ;;  %v1422_v29 = vld [vmem:[%s3094_s4 + $0x78] sm:$0xff]  ;;  %s3509_s4 = sld [smem:[#allocation31_spill]] }
 0x63c   : > { %v1797_v31 = vld [vmem:[%s774_s9] ss:$0 sm:$0xff]  ;;  %s1800_s9 = sshll.u32 %s3507_s23, 7 }
 0x63d   : > { %v3235_v55 = vadd.f32 %v1275_v30, %v3104_v1  ;;  %v2115_v1 = vpack.c.bf16 %v1314_v37, %v1313_v36  ;;  %v2154_v30 = vpack.c.bf16 %v1422_v29, %v1421_v28  ;;  %s3310_s29 = scalar_lea.hbm %s3511_s6, %s1800_s9 }
 0x63f   : > { %1281 = vadd.xlane.f32.xlu0 %v3235_v55  ;;  %v1284_v32 = vmul.f32 %v3235_v55, %v3235_v55  ;;  %2116 = vmatpush3.bf16.msra.mxu1 %v2115_v1 }
 0x640   : > { %2117 = vmatprep.subr.bf16.mxu1 %v2590_v6  ;;  %2155 = vmatpush3.bf16.msra.mxu0 %v2154_v30 }
 0x641   : > { %1285 = vadd.xlane.f32.xlu1 %v1284_v32  ;;  %p3512_p5 = scmp.ne.s32.totalorder %s3509_s4, 0 }
 0x643   : > { %2119 = vmatpush3.bf16.msra.mxu1 %v2118_v40  ;;  %p2451_p0 = pnand %p2450_p11, %p3512_p5 }
 0x644   : > { %2120 = vmatprep.subr.bf16.mxu1 %v2590_v6 }
 0x645   : > { %p2452_p9 = pneg %p2451_p0 }
 0x647   : > { %2122 = vmatpush3.bf16.msra.mxu1 %v2121_v43  ;;  %p2459_p7 = pnand %p2458_p6, %p2452_p9 }
 0x648   : > { %2123 = vmatprep.subr.bf16.mxu1 %v2590_v6 }
 0x64b   : > { %2125 = vmatpush3.bf16.msra.mxu1 %v2124_v46 }
 0x64c   : > { %2126 = vmatprep.subr.bf16.mxu1 %v2590_v6 }
 0x64f   : > { %2128 = vmatpush3.bf16.msra.mxu1 %v2127_v49 }
 0x650   : > { %2129 = vmatprep.subr.bf16.mxu1 %v2590_v6 }
 0x653   : > { %2131 = vmatpush3.bf16.msra.mxu1 %v2130_v52 }
 0x6cc   : > { %v1282_v63 = vpop.xlane.xlu0 %1281 }
 0x6cd   : > { %v1283_v0 = vmul.f32 0.03125, %v1282_v63 }
 0x6ce   : > { %v1286_v2 = vpop.xlane.xlu1 %1285 }
 0x6cf   : > { %v1288_v3 = vmul.f32 %v1283_v0, %v1283_v0  ;;  %v1287_v4 = vmul.f32 0.03125, %v1286_v2  ;;  %v1291_v9 = vsub.f32 %v3235_v55, %v1283_v0 }
 0x6d1   : > { %v1289_v5 = vsub.f32 %v1287_v4, %v1288_v3 }
 0x6d3   : > { %v1290_v7 = vmax.f32 %v1289_v5, 0.0 }
 0x6d5   : > { %v1292_v8 = vadd.f32 1e-05, %v1290_v7 }
 0x6d7   : > { %2295 = vrsqrt.f32 %v1292_v8 }
 0x6e1   : > { %v2296_v10 = vpop.eup %2295 }
 0x6e2   : > { %v1294_v12 = vmul.f32 %v2296_v10, %v1291_v9 }
 0x6e4   : > { %v1301_v14 = vmul.f32 %v1795_v11, %v1294_v12 }
 0x6e6   : > { %v1308_v15 = vadd.f32 %v1796_v13, %v1301_v14 }
 0x6e8   : > { %1991 = vmatmul.mubr.f32.vlgmr.msra.gmra.mrb[6].mxu1 %v1308_v15 }
 0x7bb   : > { %v1398_v32 = vpop.f32.mrb[6].mxu1 }
 0x7bc   : > { %v1399_v33 = vadd.f32 %v1797_v31, %v1398_v32  ;;  %v1992_v34 = vpop.f32.mrb[7].mxu1 }
 0x7be   : > { %v1403_v35 = vmul.f32 0.70710677, %v1399_v33  ;;  %v1402_v36 = vmul.f32 0.5, %v1399_v33 }
 0x7c0   : > { %2297 = verf.f32 %v1403_v35 }
 0x7ca   : > { %v2298_v6 = vpop.eup %2297 }
 0x7cb   : > { %v1405_v37 = vadd.f32 1.0, %v2298_v6 }
 0x7cd   : > { %v1406_v1 = vmul.f32 %v1405_v37, %v1402_v36 }
 0x7cf   : > { %2026 = vmatmul.mubr.f32.vlgmr.msra.gmra.mrb[4].mxu0 %v1406_v1 }
 0x8a2   : > { %v1496_v39 = vpop.f32.mrb[4].mxu0 }
 0x8a3   : > { %v1497_v40 = vadd.f32 %v1798_v38, %v1496_v39  ;;  %v2027_v41 = vpop.f32.mrb[5].mxu0 }
 0x8a5   : > { %v1500_v42 = vadd.f32 %v1497_v40, %v3235_v55 }
 0x8a7   : > { %1501 = vst [vmem:[%s3098_s15] sm:$0xff] %v1500_v42 }
 0x8a8   : > { %2462 = shalt.err (!%p2459_p7)
}
 0x8a9   : > { %s2463_s11 = scalar_lea.hbm %s3310_s29, 128  ;;  %s2467_s2 = scalar_lea.hbm %s3511_s6, 256 }
 0x8aa   : > { %p2464_p8 = scmp.ne.s32.totalorder %s3310_s29, %s2463_s11  ;;  %p2468_p3 = scmp.lt.u32.totalorder %s3310_s29, %s3511_s6 }
 0x8ab   : > { %p2469_p4 = scmp.lt.u32.totalorder %s2467_s2, %s2463_s11  ;;  %p2471_p11 = scmp.lt.u32.totalorder %s2463_s11, %s3310_s29 }
 0x8ac   : > { %p2465_p2 = pnand %p2464_p8, %p3512_p5 }
 0x8ad   : > { %p2470_p12 = por %p2469_p4, %p2468_p3 }
 0x8ae   : > { %p2466_p1 = pneg %p2465_p2 }
 0x8af   : > { %p2472_p0 = por %p2471_p11, %p2470_p12 }
 0x8b1   : > { %p2473_p9 = pnand %p2472_p0, %p2466_p1 }
 0x8b3   : > { %2476 = shalt.err (!%p2473_p9)
}
 0x8b4   : > { %2170 = dma.vmem_to_hbm [thread:$0]  (%p3512_p5), %s3312_s13, 128, %s3310_s29, %s1503_s14  }
 0x8b5 PF: > { %s3513_s28 = sld [smem:[#allocation25_spill]]  ;;  %s3514_s26 = sld [smem:[#allocation18_spill]] }
 0x8b6   : > { %s3515_s22 = sld [smem:[#allocation32_spill]] }
 0x8bb   : > { %p2193_p13 = scmp.ge.s32.totalorder %s3513_s28, 2  ;;  %s1528_s19 = sand.u32 1, %s3514_s26  }
 0x8bc   : > { %p3516_p10 = scmp.ne.s32.totalorder %s3515_s22, 0  ;;  %s1529_s0 = scalar_lea.sflag [#allocation4], %s1528_s19 }
 0x8be   : > { %p2189_p6 = pnand %p2193_p13, %p3516_p10 }
 0x8c0   : > { %2534 = dma.done.wait (!%p2189_p6), %s1529_s0, 128  }
 0x8c1   : > { %2536 = vsyncadd (!%p2189_p6), %s1529_s0, 4294967168  ;;  %s36_s23 = sadd.s32 1, %s3513_s28   ;;  %s3517_s29 = sld [smem:[#allocation16_spill]] }
 0x8c2   : > { %p33_p7 = scmp.ge.s32.totalorder %s36_s23, 6   ;;  %s3518_s30 = sld [smem:[#allocation17_spill]] }
 0x8c3   : > { %s3519_s15 = sld [smem:[#allocation29_spill]]  ;;  %s3520_s16 = sld [smem:[#allocation19_spill]] }
 0x8c4   : > { %s3521_s17 = sld [smem:[#allocation20_spill]]  ;;  %s3522_s18 = sld [smem:[#allocation30_spill]] }
 0x8c5   : > { %s3523_s19 = sld [smem:[#allocation23_spill]]  ;;  %s3524_s20 = sld [smem:[#allocation24_spill]] }
 0x8c6   : > { %s3525_s21 = sld [smem:[#allocation26_spill]]  ;;  %s3526_s22 = sld [smem:[#allocation27_spill]] }
 0x8c7   :  { %35 = sbr.rel (!%p33_p7) target bundleno = 29 (0x1d), region = 200 }
 0x8ce   :  { %1534 = vsyncpa [#allocation3], 1 }
 0x8cf   :  { %1536 = vsyncpa [#allocation3 + $0x1], 1 }
 0x8d0   :  { %1537 = vsyncpa [#allocation6], 1 }
 0x8d1   :  { %1539 = vsyncpa [#allocation6 + $0x1], 1 }
 0x8d2   :  { %1540 = vsyncpa [#allocation9], 1 }
 0x8d3   :  { %1542 = vsyncpa [#allocation9 + $0x1], 1 }
 0x8d4   :  { %1543 = vsyncpa [#allocation4], 1 }
 0x8d5   :  { %1545 = vsyncpa [#allocation4 + $0x1], 1 }

</bundles_post_ra>
